<compile_context>
chip_gen: v6e
topology: v6e:2x2x1
jax: 0.10.0
libtpu: 0.0.40
codegen_flags: <defaults>
</compile_context>

<pallas_src>
import jax
import jax.numpy as jnp
from jax import lax
from jax.experimental import pallas as pl
from jax.experimental.pallas import tpu as pltpu

# ------------------------------ configuration ------------------------------
B = 2                      # batch (triplets)
C_IN, H, W = 4, 16, 16     # NCHW image
FEAT = C_IN * H * W        # flattened image features = 1024
DIM_EMBED = 64             # embedding size
N_COND = 4                 # number of similarity conditions
HID = 32                   # ConceptBranch hidden width
EPS_NORM = 1e-12           # F.normalize eps
EPS_PD = 1e-6              # F.pairwise_distance eps

RPB = 8                    # rows per branch: f32 sublane multiple
MP = 3 * RPB               # stacked rows: x @ [0:8), y @ [8:16), z @ [16:24)
OUT_LANES = 128            # lane-dense packed output width


def _rsqrt_norm(sumsq):
    # 1 / max(||v||_2, eps) == rsqrt(max(||v||^2, eps^2)); rsqrt runs on the EUP.
    return lax.rsqrt(jnp.maximum(sumsq, jnp.float32(EPS_NORM * EPS_NORM)))


# --------------------------------- kernel ----------------------------------
def wesnet_kernel(s_ref, emb_w_ref, emb_b_ref,
                  fc1_w_ref, fc1_b_ref, fc2_w_ref, fc2_b_ref,
                  masks_ext_ref, out_ref):
    f32 = jnp.float32
    D, K = DIM_EMBED, N_COND

    # ---- single stacked embedding matmul: bf16 operands, f32 accumulation ----
    g = jnp.dot(s_ref[...], emb_w_ref[...], preferred_element_type=f32)
    g = g + emb_b_ref[...]                                        # (MP, D) f32

    # Defensively zero the pad rows (zero-padded s rows still picked up + bias).
    row_d = lax.broadcasted_iota(jnp.int32, (MP, D), 0)
    g = jnp.where((row_d % RPB) < B, g, 0.0)

    # ---- masked-norm matmul; last column is ||g||^2 thanks to the ones row ----
    m_ext = jnp.maximum(masks_ext_ref[...], 0.0)                  # (K+1, D); relu(1)=1
    msq_ext = m_ext * m_ext
    sumsq_ext = lax.dot_general(
        g * g, msq_ext, dimension_numbers=(((1,), (1,)), ((), ())),
        preferred_element_type=f32)                               # (MP, K+1)
    sumsq = sumsq_ext[:, 0:K]                                     # ||g * m_k||^2
    row_ss = sumsq_ext[:, K:K + 1]                                # ||g||^2
    inv = _rsqrt_norm(sumsq)                                      # (MP, K)

    # Row-wise L2 normalize (feeds the concept branch).
    n = g * _rsqrt_norm(row_ss)                                   # (MP, D)

    # ---- concept branch: fc1(cat([nx,ny,nz], dim=1)); 8-aligned branch slices --
    h = (jnp.dot(n[0:B, :],
                 fc1_w_ref[0 * D:1 * D, :], preferred_element_type=f32)
         + jnp.dot(n[RPB:RPB + B, :],
                   fc1_w_ref[1 * D:2 * D, :], preferred_element_type=f32)
         + jnp.dot(n[2 * RPB:2 * RPB + B, :],
                   fc1_w_ref[2 * D:3 * D, :], preferred_element_type=f32)
         + fc1_b_ref[...])
    h = jnp.maximum(h, 0.0)                                       # ReLU
    logits = jnp.dot(h, fc2_w_ref[...], preferred_element_type=f32) + fc2_b_ref[...]
    logits = logits - jnp.max(logits, axis=-1, keepdims=True)     # Softmax(dim=-1)
    e = jnp.exp(logits)
    weights = e / jnp.sum(e, axis=-1, keepdims=True)              # (B, K), exact

    # ---- all three branches + all concepts in ONE (MP,K)@(K,D) matmul ----------
    # Broadcast softmax weights into the stacked-row layout (pad rows -> 0).
    rowm = lax.broadcasted_iota(jnp.int32, (MP, K), 0) % RPB
    wt_full = jnp.where(rowm == 0, weights[0:1, :], 0.0)
    for b in range(1, B):                                         # B is tiny; unrolled
        wt_full = wt_full + jnp.where(rowm == b, weights[b:b + 1, :], 0.0)
    m = m_ext[0:K, :]                                             # (K, D) relu'd masks
    #   e_r = g_r * ( sum_k w[r,k] * inv[r,k] * m_k )
    e_all = g * jnp.dot(wt_full * inv, m, preferred_element_type=f32)   # (MP, D)

    # ---- stats ----------------------------------------------------------------
    # mean over concepts of the broadcast-mask L1 norm == B * ||relu(masks)||_1 / K
    mask_norm = jnp.float32(B) * jnp.sum(m) / jnp.float32(K)
    # Frobenius norms of the raw embeddings, averaged over the 3 branches
    # (pad rows are exactly zero, so the 8-row slices are safe).
    embed_norm = (jnp.sqrt(jnp.sum(row_ss[0:RPB, :]))
                  + jnp.sqrt(jnp.sum(row_ss[RPB:2 * RPB, :]))
                  + jnp.sqrt(jnp.sum(row_ss[2 * RPB:3 * RPB, :]))) / 3.0
    # Last-concept normalized-masked-embedding norm (reference keeps only the
    # final loop iteration's value):  ||normalize(g*m_K)||_F^2 = sum sumsq*inv^2.
    tlast = sumsq[:, K - 1:K] * jnp.square(inv[:, K - 1:K])       # (MP, 1); pad rows 0
    mask_embed_norm = (jnp.sqrt(jnp.sum(tlast[0:RPB, :]))
                       + jnp.sqrt(jnp.sum(tlast[RPB:2 * RPB, :]))
                       + jnp.sqrt(jnp.sum(tlast[2 * RPB:3 * RPB, :]))) / 3.0

    # ---- pairwise distances: F.pairwise_distance(a,b,2) = ||a - b + eps||_2 ----
    ex = e_all[0:RPB, :]                                          # 8-aligned views
    ey = e_all[RPB:2 * RPB, :]
    ez = e_all[2 * RPB:3 * RPB, :]
    da = ex - ey + EPS_PD
    db = ex - ez + EPS_PD
    dist_a = jnp.sqrt(jnp.sum(da * da, axis=1, keepdims=True))    # (RPB, 1)
    dist_b = jnp.sqrt(jnp.sum(db * db, axis=1, keepdims=True))    # (RPB, 1)

    # ---- single full-block lane-dense store -----------------------------------
    # lane 0: dist_a, lane 1: dist_b, lanes 2..4: scalar stats; rows >= B -> 0.
    lane = lax.broadcasted_iota(jnp.int32, (RPB, OUT_LANES), 1)
    rowo = lax.broadcasted_iota(jnp.int32, (RPB, OUT_LANES), 0)
    payload = (jnp.where(lane == 0, dist_a, 0.0)
               + jnp.where(lane == 1, dist_b, 0.0)
               + jnp.where(lane == 2, mask_norm, 0.0)
               + jnp.where(lane == 3, embed_norm, 0.0)
               + jnp.where(lane == 4, mask_embed_norm, 0.0))
    out_ref[...] = jnp.where(rowo < B, payload, 0.0)


# -------------------------------- wrapper ----------------------------------
def _cost_estimate():
    flops = (2 * MP * FEAT * DIM_EMBED                 # embedding matmul
             + 2 * MP * DIM_EMBED * (N_COND + 1)       # (g^2)@[m^2|1]^T
             + 2 * MP * N_COND * DIM_EMBED             # fused combined-mask matmul
             + 3 * 2 * B * DIM_EMBED * HID             # fc1 (three slices)
             + 2 * B * HID * N_COND                    # fc2
             + 16 * MP * DIM_EMBED)                    # elementwise
    transcendentals = MP * (1 + N_COND) + B * N_COND + 2 * RPB + 8
    bytes_accessed = (2 * (MP * FEAT + FEAT * DIM_EMBED)            # bf16 s, emb_w
                      + 4 * (DIM_EMBED + 3 * DIM_EMBED * HID + HID
                             + HID * N_COND + N_COND
                             + (N_COND + 1) * DIM_EMBED
                             + RPB * OUT_LANES))
    return pl.CostEstimate(flops=flops, transcendentals=transcendentals,
                           bytes_accessed=bytes_accessed)


@jax.jit
def wesnet_forward(x, y, z, params):
    f32 = jnp.float32
    xf = x.reshape(x.shape[0], -1).astype(f32)
    yf = y.reshape(y.shape[0], -1).astype(f32)
    zf = z.reshape(z.shape[0], -1).astype(f32)

    # Stack anchor/negative/positive with each branch padded to a full 8-row
    # sublane group (single pad folded into one concatenate), then cast to bf16
    # so the embedding weight goes through the MXU once with bf16 operands.
    imgs = jnp.stack([xf, yf, zf], axis=0)                              # (3, B, FEAT)
    imgs = jnp.concatenate(
        [imgs, jnp.zeros((3, RPB - B, FEAT), f32)], axis=1)             # (3, RPB, FEAT)
    s = imgs.reshape(MP, FEAT).astype(jnp.bfloat16)

    # Append a ones row to the masks so ||g||^2 falls out of the masked-norm
    # matmul as its last column (relu(1) == 1 inside the kernel).
    masks_ext = jnp.concatenate(
        [params["masks"], jnp.ones((1, DIM_EMBED), f32)], axis=0)       # (K+1, D)

    vmem = pl.BlockSpec(memory_space=pltpu.MemorySpace.VMEM)
    # TODO(synk): for realistic batches, add a grid over the stacked-row axis
    # (weights pinned via index_map lambda i: (0, 0)), mark it
    # dimension_semantics=("parallel",) so v7x's second TensorCore is used, and
    # budget row tiles against 64 MiB VMEM (vmem_limit_bytes) on v7x.
    out = pl.pallas_call(
        wesnet_kernel,
        out_shape=jax.ShapeDtypeStruct((RPB, OUT_LANES), jnp.float32),
        in_specs=[vmem] * 8,
        out_specs=vmem,
        cost_estimate=_cost_estimate(),
    )(s,
      params["emb_w"], params["emb_b"],
      params["fc1_w"], params["fc1_b"],
      params["fc2_w"], params["fc2_b"],
      masks_ext)

    dist_a = out[:B, 0]
    dist_b = out[:B, 1]
    return (dist_a, dist_b, out[0, 2], out[0, 3], out[0, 4])


def init_params(key):
    ks = jax.random.split(key, 6)

    def uniform(k, shape, fan_in):
        bound = 1.0 / jnp.sqrt(jnp.float32(fan_in))
        return jax.random.uniform(k, shape, jnp.float32, -bound, bound)

    params = {
        # embedding net (external in the reference): Linear(FEAT, DIM_EMBED).
        # Weight stored bf16: bf16 MXU operands + halves the biggest DMA;
        # accumulation stays f32 inside the kernel.
        "emb_w": uniform(ks[0], (FEAT, DIM_EMBED), FEAT).astype(jnp.bfloat16),
        "emb_b": uniform(ks[1], (1, DIM_EMBED), FEAT),
        # ConceptBranch fc1: Linear(3*DIM_EMBED, 32) + ReLU
        "fc1_w": uniform(ks[2], (3 * DIM_EMBED, HID), 3 * DIM_EMBED),
        "fc1_b": uniform(ks[3], (1, HID), 3 * DIM_EMBED),
        # ConceptBranch fc2: Linear(32, N_COND) + Softmax
        "fc2_w": uniform(ks[4], (HID, N_COND), HID),
        "fc2_b": uniform(ks[5], (1, N_COND), HID),
        # ConditionalSimNet masks: Embedding(N_COND, DIM_EMBED) ~ N(0.9, 0.7)
        # (learnedmask=True, prein=False -> ReLU applied in the kernel)
        "masks": 0.9 + 0.7 * jax.random.normal(
            jax.random.PRNGKey(123), (N_COND, DIM_EMBED), jnp.float32),
    }
    return params


if __name__ == "__main__":
    key = jax.random.PRNGKey(0)
    kx, ky, kz, kp = jax.random.split(key, 4)

    x = jax.random.normal(kx, (B, C_IN, H, W), jnp.float32)   # anchor
    y = jax.random.normal(ky, (B, C_IN, H, W), jnp.float32)   # negative
    z = jax.random.normal(kz, (B, C_IN, H, W), jnp.float32)   # positive

    params = init_params(kp)

    out = wesnet_forward(x, y, z, params)
    out = jax.block_until_ready(out)

    dist_a, dist_b, mask_norm, embed_norm, mask_embed_norm = out
    assert dist_a.shape == (B,) and dist_b.shape == (B,)
    assert bool(jnp.all(jnp.isfinite(dist_a))) and bool(jnp.all(jnp.isfinite(dist_b)))
    assert bool(jnp.isfinite(mask_norm)) and bool(jnp.isfinite(embed_norm))
    assert bool(jnp.isfinite(mask_embed_norm))
    print("KERNEL_OK")
</pallas_src>

<mosaic_0001>
module attributes {stable_mosaic.version = 11 : i64} {
  func.func @wesnet_kernel(%arg0: memref<24x1024xbf16, #tpu.memory_space<vmem>>, %arg1: memref<1024x64xbf16, #tpu.memory_space<vmem>>, %arg2: memref<1x64xf32, #tpu.memory_space<vmem>>, %arg3: memref<192x32xf32, #tpu.memory_space<vmem>>, %arg4: memref<1x32xf32, #tpu.memory_space<vmem>>, %arg5: memref<32x4xf32, #tpu.memory_space<vmem>>, %arg6: memref<1x4xf32, #tpu.memory_space<vmem>>, %arg7: memref<5x64xf32, #tpu.memory_space<vmem>>, %arg8: memref<8x128xf32, #tpu.memory_space<vmem>>) attributes {dimension_semantics = [], scalar_prefetch = 0 : i64, scratch_operands = 0 : i64, tpu.core_type = #tpu.core_type<tc>} {
    %c0 = arith.constant 0 : index
    %c0_0 = arith.constant 0 : index
    %0 = vector.load %arg0[%c0, %c0_0] : memref<24x1024xbf16, #tpu.memory_space<vmem>>, vector<24x1024xbf16>
    %c0_1 = arith.constant 0 : index
    %c0_2 = arith.constant 0 : index
    %1 = vector.load %arg1[%c0_1, %c0_2] : memref<1024x64xbf16, #tpu.memory_space<vmem>>, vector<1024x64xbf16>
    %cst = arith.constant dense<0.000000e+00> : vector<24x64xf32>
    %2 = tpu.matmul %0, %1, %cst {dimension_numbers = #tpu.dot_dimension_numbers<[1], [0], [0], [1], [0, 0, 1, 1], [], []>} : vector<24x1024xbf16>, vector<1024x64xbf16>, vector<24x64xf32> -> vector<24x64xf32>
    %c0_3 = arith.constant 0 : index
    %c0_4 = arith.constant 0 : index
    %3 = vector.load %arg2[%c0_3, %c0_4] : memref<1x64xf32, #tpu.memory_space<vmem>>, vector<1x64xf32>
    %4 = vector.broadcast %3 : vector<1x64xf32> to vector<24x64xf32>
    %5 = arith.addf %2, %4 : vector<24x64xf32>
    %6 = tpu.iota {dimensions = array<i32: 0>} : vector<24x64xi32>
    %c8_i32 = arith.constant 8 : i32
    %c0_i32 = arith.constant 0 : i32
    %7 = arith.cmpi eq, %c8_i32, %c0_i32 : i32
    %c1_i32 = arith.constant 1 : i32
    %8 = arith.select %7, %c1_i32, %c8_i32 : i32
    %9 = vector.broadcast %8 : i32 to vector<24x64xi32>
    %10 = arith.remsi %6, %9 : vector<24x64xi32>
    %c0_i32_5 = arith.constant 0 : i32
    %11 = vector.broadcast %c0_i32_5 : i32 to vector<24x64xi32>
    %12 = arith.cmpi ne, %10, %11 : vector<24x64xi32>
    %c0_i32_6 = arith.constant 0 : i32
    %13 = vector.broadcast %c0_i32_6 : i32 to vector<24x64xi32>
    %14 = arith.cmpi slt, %10, %13 : vector<24x64xi32>
    %c0_i32_7 = arith.constant 0 : i32
    %15 = arith.cmpi slt, %8, %c0_i32_7 : i32
    %16 = vector.broadcast %15 : i1 to vector<24x64xi1>
    %17 = vector.broadcast %16 : vector<24x64xi1> to vector<24x64xi1>
    %18 = arith.xori %14, %17 : vector<24x64xi1>
    %19 = arith.andi %18, %12 : vector<24x64xi1>
    %20 = vector.broadcast %8 : i32 to vector<24x64xi32>
    %21 = arith.addi %10, %20 : vector<24x64xi32>
    %22 = arith.select %19, %21, %10 : vector<24x64xi1>, vector<24x64xi32>
    %c2_i32 = arith.constant 2 : i32
    %23 = vector.broadcast %c2_i32 : i32 to vector<24x64xi32>
    %24 = arith.cmpi slt, %22, %23 : vector<24x64xi32>
    %cst_8 = arith.constant 0.000000e+00 : f32
    %25 = vector.broadcast %cst_8 : f32 to vector<24x64xf32>
    %26 = arith.select %24, %5, %25 : vector<24x64xi1>, vector<24x64xf32>
    %c0_9 = arith.constant 0 : index
    %c0_10 = arith.constant 0 : index
    %27 = vector.load %arg7[%c0_9, %c0_10] : memref<5x64xf32, #tpu.memory_space<vmem>>, vector<5x64xf32>
    %cst_11 = arith.constant 0.000000e+00 : f32
    %28 = vector.broadcast %cst_11 : f32 to vector<5x64xf32>
    %29 = arith.maximumf %27, %28 : vector<5x64xf32>
    %30 = arith.mulf %29, %29 : vector<5x64xf32>
    %31 = arith.mulf %26, %26 : vector<24x64xf32>
    %cst_12 = arith.constant dense<0.000000e+00> : vector<24x5xf32>
    %32 = tpu.matmul %31, %30, %cst_12 {dimension_numbers = #tpu.dot_dimension_numbers<[1], [1], [0], [0], [0, 0, 1, 0], [], []>} : vector<24x64xf32>, vector<5x64xf32>, vector<24x5xf32> -> vector<24x5xf32>
    %33 = vector.extract_strided_slice %32 {offsets = [0, 0], sizes = [24, 4], strides = [1, 1]} : vector<24x5xf32> to vector<24x4xf32>
    %34 = vector.extract_strided_slice %32 {offsets = [0, 4], sizes = [24, 1], strides = [1, 1]} : vector<24x5xf32> to vector<24x1xf32>
    %cst_13 = arith.constant 1.000000e-24 : f32
    %35 = vector.broadcast %cst_13 : f32 to vector<24x4xf32>
    %36 = arith.maximumf %33, %35 : vector<24x4xf32>
    %37 = math.rsqrt %36 : vector<24x4xf32>
    %cst_14 = arith.constant 1.000000e-24 : f32
    %38 = vector.broadcast %cst_14 : f32 to vector<24x1xf32>
    %39 = arith.maximumf %34, %38 : vector<24x1xf32>
    %40 = math.rsqrt %39 : vector<24x1xf32>
    %41 = vector.broadcast %40 : vector<24x1xf32> to vector<24x64xf32>
    %42 = arith.mulf %26, %41 : vector<24x64xf32>
    %43 = vector.extract_strided_slice %42 {offsets = [0, 0], sizes = [2, 64], strides = [1, 1]} : vector<24x64xf32> to vector<2x64xf32>
    %c0_15 = arith.constant 0 : index
    %c0_16 = arith.constant 0 : index
    %44 = vector.load %arg3[%c0_15, %c0_16] : memref<192x32xf32, #tpu.memory_space<vmem>>, vector<64x32xf32>
    %cst_17 = arith.constant dense<0.000000e+00> : vector<2x32xf32>
    %45 = tpu.matmul %43, %44, %cst_17 {dimension_numbers = #tpu.dot_dimension_numbers<[1], [0], [0], [1], [0, 0, 1, 1], [], []>} : vector<2x64xf32>, vector<64x32xf32>, vector<2x32xf32> -> vector<2x32xf32>
    %46 = vector.extract_strided_slice %42 {offsets = [8, 0], sizes = [2, 64], strides = [1, 1]} : vector<24x64xf32> to vector<2x64xf32>
    %c64 = arith.constant 64 : index
    %c0_18 = arith.constant 0 : index
    %47 = vector.load %arg3[%c64, %c0_18] : memref<192x32xf32, #tpu.memory_space<vmem>>, vector<64x32xf32>
    %cst_19 = arith.constant dense<0.000000e+00> : vector<2x32xf32>
    %48 = tpu.matmul %46, %47, %cst_19 {dimension_numbers = #tpu.dot_dimension_numbers<[1], [0], [0], [1], [0, 0, 1, 1], [], []>} : vector<2x64xf32>, vector<64x32xf32>, vector<2x32xf32> -> vector<2x32xf32>
    %49 = arith.addf %45, %48 : vector<2x32xf32>
    %50 = vector.extract_strided_slice %42 {offsets = [16, 0], sizes = [2, 64], strides = [1, 1]} : vector<24x64xf32> to vector<2x64xf32>
    %c128 = arith.constant 128 : index
    %c0_20 = arith.constant 0 : index
    %51 = vector.load %arg3[%c128, %c0_20] : memref<192x32xf32, #tpu.memory_space<vmem>>, vector<64x32xf32>
    %cst_21 = arith.constant dense<0.000000e+00> : vector<2x32xf32>
    %52 = tpu.matmul %50, %51, %cst_21 {dimension_numbers = #tpu.dot_dimension_numbers<[1], [0], [0], [1], [0, 0, 1, 1], [], []>} : vector<2x64xf32>, vector<64x32xf32>, vector<2x32xf32> -> vector<2x32xf32>
    %53 = arith.addf %49, %52 : vector<2x32xf32>
    %c0_22 = arith.constant 0 : index
    %c0_23 = arith.constant 0 : index
    %54 = vector.load %arg4[%c0_22, %c0_23] : memref<1x32xf32, #tpu.memory_space<vmem>>, vector<1x32xf32>
    %55 = vector.broadcast %54 : vector<1x32xf32> to vector<2x32xf32>
    %56 = arith.addf %53, %55 : vector<2x32xf32>
    %cst_24 = arith.constant 0.000000e+00 : f32
    %57 = vector.broadcast %cst_24 : f32 to vector<2x32xf32>
    %58 = arith.maximumf %56, %57 : vector<2x32xf32>
    %c0_25 = arith.constant 0 : index
    %c0_26 = arith.constant 0 : index
    %59 = vector.load %arg5[%c0_25, %c0_26] : memref<32x4xf32, #tpu.memory_space<vmem>>, vector<32x4xf32>
    %cst_27 = arith.constant dense<0.000000e+00> : vector<2x4xf32>
    %60 = tpu.matmul %58, %59, %cst_27 {dimension_numbers = #tpu.dot_dimension_numbers<[1], [0], [0], [1], [0, 0, 1, 1], [], []>} : vector<2x32xf32>, vector<32x4xf32>, vector<2x4xf32> -> vector<2x4xf32>
    %c0_28 = arith.constant 0 : index
    %c0_29 = arith.constant 0 : index
    %61 = vector.load %arg6[%c0_28, %c0_29] : memref<1x4xf32, #tpu.memory_space<vmem>>, vector<1x4xf32>
    %62 = vector.broadcast %61 : vector<1x4xf32> to vector<2x4xf32>
    %63 = arith.addf %60, %62 : vector<2x4xf32>
    %cst_30 = arith.constant dense<0xFF800000> : vector<2xf32>
    %64 = vector.multi_reduction <maximumf>, %63, %cst_30 [1] : vector<2x4xf32> to vector<2xf32>
    %65 = vector.shape_cast %64 : vector<2xf32> to vector<2x1xf32>
    %66 = vector.broadcast %65 : vector<2x1xf32> to vector<2x4xf32>
    %67 = arith.subf %63, %66 : vector<2x4xf32>
    %68 = math.exp %67 : vector<2x4xf32>
    %cst_31 = arith.constant dense<0.000000e+00> : vector<2xf32>
    %69 = vector.multi_reduction <add>, %68, %cst_31 [1] : vector<2x4xf32> to vector<2xf32>
    %70 = vector.shape_cast %69 : vector<2xf32> to vector<2x1xf32>
    %71 = vector.broadcast %70 : vector<2x1xf32> to vector<2x4xf32>
    %72 = arith.divf %68, %71 : vector<2x4xf32>
    %73 = tpu.iota {dimensions = array<i32: 0>} : vector<24x4xi32>
    %c8_i32_32 = arith.constant 8 : i32
    %c0_i32_33 = arith.constant 0 : i32
    %74 = arith.cmpi eq, %c8_i32_32, %c0_i32_33 : i32
    %c1_i32_34 = arith.constant 1 : i32
    %75 = arith.select %74, %c1_i32_34, %c8_i32_32 : i32
    %76 = vector.broadcast %75 : i32 to vector<24x4xi32>
    %77 = arith.remsi %73, %76 : vector<24x4xi32>
    %c0_i32_35 = arith.constant 0 : i32
    %78 = vector.broadcast %c0_i32_35 : i32 to vector<24x4xi32>
    %79 = arith.cmpi ne, %77, %78 : vector<24x4xi32>
    %c0_i32_36 = arith.constant 0 : i32
    %80 = vector.broadcast %c0_i32_36 : i32 to vector<24x4xi32>
    %81 = arith.cmpi slt, %77, %80 : vector<24x4xi32>
    %c0_i32_37 = arith.constant 0 : i32
    %82 = arith.cmpi slt, %75, %c0_i32_37 : i32
    %83 = vector.broadcast %82 : i1 to vector<24x4xi1>
    %84 = vector.broadcast %83 : vector<24x4xi1> to vector<24x4xi1>
    %85 = arith.xori %81, %84 : vector<24x4xi1>
    %86 = arith.andi %85, %79 : vector<24x4xi1>
    %87 = vector.broadcast %75 : i32 to vector<24x4xi32>
    %88 = arith.addi %77, %87 : vector<24x4xi32>
    %89 = arith.select %86, %88, %77 : vector<24x4xi1>, vector<24x4xi32>
    %c0_i32_38 = arith.constant 0 : i32
    %90 = vector.broadcast %c0_i32_38 : i32 to vector<24x4xi32>
    %91 = arith.cmpi eq, %89, %90 : vector<24x4xi32>
    %92 = vector.extract_strided_slice %72 {offsets = [0, 0], sizes = [1, 4], strides = [1, 1]} : vector<2x4xf32> to vector<1x4xf32>
    %cst_39 = arith.constant 0.000000e+00 : f32
    %93 = vector.shape_cast %92 : vector<1x4xf32> to vector<1x4xf32>
    %94 = vector.broadcast %93 : vector<1x4xf32> to vector<24x4xf32>
    %95 = vector.broadcast %cst_39 : f32 to vector<24x4xf32>
    %96 = arith.select %91, %94, %95 : vector<24x4xi1>, vector<24x4xf32>
    %c1_i32_40 = arith.constant 1 : i32
    %97 = vector.broadcast %c1_i32_40 : i32 to vector<24x4xi32>
    %98 = arith.cmpi eq, %89, %97 : vector<24x4xi32>
    %99 = vector.extract_strided_slice %72 {offsets = [1, 0], sizes = [1, 4], strides = [1, 1]} : vector<2x4xf32> to vector<1x4xf32>
    %cst_41 = arith.constant 0.000000e+00 : f32
    %100 = vector.shape_cast %99 : vector<1x4xf32> to vector<1x4xf32>
    %101 = vector.broadcast %100 : vector<1x4xf32> to vector<24x4xf32>
    %102 = vector.broadcast %cst_41 : f32 to vector<24x4xf32>
    %103 = arith.select %98, %101, %102 : vector<24x4xi1>, vector<24x4xf32>
    %104 = arith.addf %96, %103 : vector<24x4xf32>
    %105 = vector.extract_strided_slice %29 {offsets = [0, 0], sizes = [4, 64], strides = [1, 1]} : vector<5x64xf32> to vector<4x64xf32>
    %106 = arith.mulf %104, %37 : vector<24x4xf32>
    %cst_42 = arith.constant dense<0.000000e+00> : vector<24x64xf32>
    %107 = tpu.matmul %106, %105, %cst_42 {dimension_numbers = #tpu.dot_dimension_numbers<[1], [0], [0], [1], [0, 0, 1, 1], [], []>} : vector<24x4xf32>, vector<4x64xf32>, vector<24x64xf32> -> vector<24x64xf32>
    %108 = arith.mulf %26, %107 : vector<24x64xf32>
    %109 = vector.shape_cast %105 : vector<4x64xf32> to vector<1x4x64xf32>
    %cst_43 = arith.constant dense<0.000000e+00> : vector<1xf32>
    %110 = vector.multi_reduction <add>, %109, %cst_43 [1, 2] : vector<1x4x64xf32> to vector<1xf32>
    %111 = vector.shape_cast %110 : vector<1xf32> to vector<1x1x1xf32>
    %112 = vector.extract %111[0, 0, 0] : f32 from vector<1x1x1xf32>
    %cst_44 = arith.constant 2.000000e+00 : f32
    %113 = arith.mulf %cst_44, %112 : f32
    %cst_45 = arith.constant 4.000000e+00 : f32
    %114 = arith.divf %113, %cst_45 : f32
    %115 = vector.extract_strided_slice %34 {offsets = [0, 0], sizes = [8, 1], strides = [1, 1]} : vector<24x1xf32> to vector<8x1xf32>
    %116 = vector.shape_cast %115 : vector<8x1xf32> to vector<1x8x1xf32>
    %cst_46 = arith.constant dense<0.000000e+00> : vector<1xf32>
    %117 = vector.multi_reduction <add>, %116, %cst_46 [1, 2] : vector<1x8x1xf32> to vector<1xf32>
    %118 = vector.shape_cast %117 : vector<1xf32> to vector<1x1x1xf32>
    %119 = vector.extract %118[0, 0, 0] : f32 from vector<1x1x1xf32>
    %120 = math.sqrt %119 : f32
    %121 = vector.extract_strided_slice %34 {offsets = [8, 0], sizes = [8, 1], strides = [1, 1]} : vector<24x1xf32> to vector<8x1xf32>
    %122 = vector.shape_cast %121 : vector<8x1xf32> to vector<1x8x1xf32>
    %cst_47 = arith.constant dense<0.000000e+00> : vector<1xf32>
    %123 = vector.multi_reduction <add>, %122, %cst_47 [1, 2] : vector<1x8x1xf32> to vector<1xf32>
    %124 = vector.shape_cast %123 : vector<1xf32> to vector<1x1x1xf32>
    %125 = vector.extract %124[0, 0, 0] : f32 from vector<1x1x1xf32>
    %126 = math.sqrt %125 : f32
    %127 = arith.addf %120, %126 : f32
    %128 = vector.extract_strided_slice %34 {offsets = [16, 0], sizes = [8, 1], strides = [1, 1]} : vector<24x1xf32> to vector<8x1xf32>
    %129 = vector.shape_cast %128 : vector<8x1xf32> to vector<1x8x1xf32>
    %cst_48 = arith.constant dense<0.000000e+00> : vector<1xf32>
    %130 = vector.multi_reduction <add>, %129, %cst_48 [1, 2] : vector<1x8x1xf32> to vector<1xf32>
    %131 = vector.shape_cast %130 : vector<1xf32> to vector<1x1x1xf32>
    %132 = vector.extract %131[0, 0, 0] : f32 from vector<1x1x1xf32>
    %133 = math.sqrt %132 : f32
    %134 = arith.addf %127, %133 : f32
    %cst_49 = arith.constant 3.000000e+00 : f32
    %135 = arith.divf %134, %cst_49 : f32
    %136 = vector.extract_strided_slice %33 {offsets = [0, 3], sizes = [24, 1], strides = [1, 1]} : vector<24x4xf32> to vector<24x1xf32>
    %137 = vector.extract_strided_slice %37 {offsets = [0, 3], sizes = [24, 1], strides = [1, 1]} : vector<24x4xf32> to vector<24x1xf32>
    %138 = arith.mulf %137, %137 : vector<24x1xf32>
    %139 = arith.mulf %136, %138 : vector<24x1xf32>
    %140 = vector.extract_strided_slice %139 {offsets = [0, 0], sizes = [8, 1], strides = [1, 1]} : vector<24x1xf32> to vector<8x1xf32>
    %141 = vector.shape_cast %140 : vector<8x1xf32> to vector<1x8x1xf32>
    %cst_50 = arith.constant dense<0.000000e+00> : vector<1xf32>
    %142 = vector.multi_reduction <add>, %141, %cst_50 [1, 2] : vector<1x8x1xf32> to vector<1xf32>
    %143 = vector.shape_cast %142 : vector<1xf32> to vector<1x1x1xf32>
    %144 = vector.extract %143[0, 0, 0] : f32 from vector<1x1x1xf32>
    %145 = math.sqrt %144 : f32
    %146 = vector.extract_strided_slice %139 {offsets = [8, 0], sizes = [8, 1], strides = [1, 1]} : vector<24x1xf32> to vector<8x1xf32>
    %147 = vector.shape_cast %146 : vector<8x1xf32> to vector<1x8x1xf32>
    %cst_51 = arith.constant dense<0.000000e+00> : vector<1xf32>
    %148 = vector.multi_reduction <add>, %147, %cst_51 [1, 2] : vector<1x8x1xf32> to vector<1xf32>
    %149 = vector.shape_cast %148 : vector<1xf32> to vector<1x1x1xf32>
    %150 = vector.extract %149[0, 0, 0] : f32 from vector<1x1x1xf32>
    %151 = math.sqrt %150 : f32
    %152 = arith.addf %145, %151 : f32
    %153 = vector.extract_strided_slice %139 {offsets = [16, 0], sizes = [8, 1], strides = [1, 1]} : vector<24x1xf32> to vector<8x1xf32>
    %154 = vector.shape_cast %153 : vector<8x1xf32> to vector<1x8x1xf32>
    %cst_52 = arith.constant dense<0.000000e+00> : vector<1xf32>
    %155 = vector.multi_reduction <add>, %154, %cst_52 [1, 2] : vector<1x8x1xf32> to vector<1xf32>
    %156 = vector.shape_cast %155 : vector<1xf32> to vector<1x1x1xf32>
    %157 = vector.extract %156[0, 0, 0] : f32 from vector<1x1x1xf32>
    %158 = math.sqrt %157 : f32
    %159 = arith.addf %152, %158 : f32
    %cst_53 = arith.constant 3.000000e+00 : f32
    %160 = arith.divf %159, %cst_53 : f32
    %161 = vector.extract_strided_slice %108 {offsets = [0, 0], sizes = [8, 64], strides = [1, 1]} : vector<24x64xf32> to vector<8x64xf32>
    %162 = vector.extract_strided_slice %108 {offsets = [8, 0], sizes = [8, 64], strides = [1, 1]} : vector<24x64xf32> to vector<8x64xf32>
    %163 = vector.extract_strided_slice %108 {offsets = [16, 0], sizes = [8, 64], strides = [1, 1]} : vector<24x64xf32> to vector<8x64xf32>
    %164 = arith.subf %161, %162 : vector<8x64xf32>
    %cst_54 = arith.constant 9.99999997E-7 : f32
    %165 = vector.broadcast %cst_54 : f32 to vector<8x64xf32>
    %166 = arith.addf %164, %165 : vector<8x64xf32>
    %167 = arith.subf %161, %163 : vector<8x64xf32>
    %cst_55 = arith.constant 9.99999997E-7 : f32
    %168 = vector.broadcast %cst_55 : f32 to vector<8x64xf32>
    %169 = arith.addf %167, %168 : vector<8x64xf32>
    %170 = arith.mulf %166, %166 : vector<8x64xf32>
    %cst_56 = arith.constant dense<0.000000e+00> : vector<8xf32>
    %171 = vector.multi_reduction <add>, %170, %cst_56 [1] : vector<8x64xf32> to vector<8xf32>
    %172 = vector.shape_cast %171 : vector<8xf32> to vector<8x1xf32>
    %173 = math.sqrt %172 : vector<8x1xf32>
    %174 = arith.mulf %169, %169 : vector<8x64xf32>
    %cst_57 = arith.constant dense<0.000000e+00> : vector<8xf32>
    %175 = vector.multi_reduction <add>, %174, %cst_57 [1] : vector<8x64xf32> to vector<8xf32>
    %176 = vector.shape_cast %175 : vector<8xf32> to vector<8x1xf32>
    %177 = math.sqrt %176 : vector<8x1xf32>
    %178 = tpu.iota {dimensions = array<i32: 1>} : vector<8x128xi32>
    %179 = tpu.iota {dimensions = array<i32: 0>} : vector<8x128xi32>
    %c0_i32_58 = arith.constant 0 : i32
    %180 = vector.broadcast %c0_i32_58 : i32 to vector<8x128xi32>
    %181 = arith.cmpi eq, %178, %180 : vector<8x128xi32>
    %cst_59 = arith.constant 0.000000e+00 : f32
    %182 = vector.shape_cast %173 : vector<8x1xf32> to vector<8x1xf32>
    %183 = vector.broadcast %182 : vector<8x1xf32> to vector<8x128xf32>
    %184 = vector.broadcast %cst_59 : f32 to vector<8x128xf32>
    %185 = arith.select %181, %183, %184 : vector<8x128xi1>, vector<8x128xf32>
    %c1_i32_60 = arith.constant 1 : i32
    %186 = vector.broadcast %c1_i32_60 : i32 to vector<8x128xi32>
    %187 = arith.cmpi eq, %178, %186 : vector<8x128xi32>
    %cst_61 = arith.constant 0.000000e+00 : f32
    %188 = vector.shape_cast %177 : vector<8x1xf32> to vector<8x1xf32>
    %189 = vector.broadcast %188 : vector<8x1xf32> to vector<8x128xf32>
    %190 = vector.broadcast %cst_61 : f32 to vector<8x128xf32>
    %191 = arith.select %187, %189, %190 : vector<8x128xi1>, vector<8x128xf32>
    %192 = arith.addf %185, %191 : vector<8x128xf32>
    %c2_i32_62 = arith.constant 2 : i32
    %193 = vector.broadcast %c2_i32_62 : i32 to vector<8x128xi32>
    %194 = arith.cmpi eq, %178, %193 : vector<8x128xi32>
    %cst_63 = arith.constant 0.000000e+00 : f32
    %195 = vector.broadcast %114 : f32 to vector<8x128xf32>
    %196 = vector.broadcast %cst_63 : f32 to vector<8x128xf32>
    %197 = arith.select %194, %195, %196 : vector<8x128xi1>, vector<8x128xf32>
    %198 = arith.addf %192, %197 : vector<8x128xf32>
    %c3_i32 = arith.constant 3 : i32
    %199 = vector.broadcast %c3_i32 : i32 to vector<8x128xi32>
    %200 = arith.cmpi eq, %178, %199 : vector<8x128xi32>
    %cst_64 = arith.constant 0.000000e+00 : f32
    %201 = vector.broadcast %135 : f32 to vector<8x128xf32>
    %202 = vector.broadcast %cst_64 : f32 to vector<8x128xf32>
    %203 = arith.select %200, %201, %202 : vector<8x128xi1>, vector<8x128xf32>
    %204 = arith.addf %198, %203 : vector<8x128xf32>
    %c4_i32 = arith.constant 4 : i32
    %205 = vector.broadcast %c4_i32 : i32 to vector<8x128xi32>
    %206 = arith.cmpi eq, %178, %205 : vector<8x128xi32>
    %cst_65 = arith.constant 0.000000e+00 : f32
    %207 = vector.broadcast %160 : f32 to vector<8x128xf32>
    %208 = vector.broadcast %cst_65 : f32 to vector<8x128xf32>
    %209 = arith.select %206, %207, %208 : vector<8x128xi1>, vector<8x128xf32>
    %210 = arith.addf %204, %209 : vector<8x128xf32>
    %c2_i32_66 = arith.constant 2 : i32
    %211 = vector.broadcast %c2_i32_66 : i32 to vector<8x128xi32>
    %212 = arith.cmpi slt, %179, %211 : vector<8x128xi32>
    %cst_67 = arith.constant 0.000000e+00 : f32
    %213 = vector.broadcast %cst_67 : f32 to vector<8x128xf32>
    %214 = arith.select %212, %210, %213 : vector<8x128xi1>, vector<8x128xf32>
    %c0_68 = arith.constant 0 : index
    %c0_69 = arith.constant 0 : index
    %215 = vector.load %arg8[%c0_68, %c0_69] : memref<8x128xf32, #tpu.memory_space<vmem>>, vector<8x128xf32>
    tpu.vector_store %arg8[%c0_68, %c0_69], %214 {strides = array<i32>} : memref<8x128xf32, #tpu.memory_space<vmem>>, vector<8x128xf32>,
    return
  }
}

</mosaic_0001>

<bundles_post_ra>
// kernel: wesnet_forward.1
= control target key start
LH: loop header
LB: loop body
LE: loop exit
PB: predicated region body
PF: predicated region fallthrough
CT: control target
= control target key end

     0   :  { %vm873_vm0 = vcmask 523264   ;;  %vm2154_vm1 = vmmov 0   ;;  %s2156_s9 = smov 124   ;;  %vm1463_vm5 = vcmask 519168   ;;  %vm1482_vm6 = vcmask 7168   ;;  %s2157_s14 = smov 125   ;;  %s2703_s1 = inlined_call_operand.vmem [shape: bf16[1024,64], index: 1, kind: input, shape index: {}]   ;;  %s2704_s0 = inlined_call_operand.vmem [shape: bf16[24,1024], index: 0, kind: input, shape index: {}]   ;;  %s2705_s7 = inlined_call_operand.vmem [shape: f32[5,64], index: 7, kind: input, shape index: {}]   ;;  %s2706_s2 = inlined_call_operand.vmem [shape: f32[1,64], index: 2, kind: input, shape index: {}]   ;;  %s2707_s3 = inlined_call_operand.vmem [shape: f32[192,32], index: 3, kind: input, shape index: {}]   ;;  %s2708_s5 = inlined_call_operand.vmem [shape: f32[32,4], index: 5, kind: input, shape index: {}]   ;;  %s2709_s4 = inlined_call_operand.vmem [shape: f32[1,32], index: 4, kind: input, shape index: {}]   ;;  %s2710_s6 = inlined_call_operand.vmem [shape: f32[1,4], index: 6, kind: input, shape index: {}]   ;;  %s2711_s8 = inlined_call_operand.vmem [shape: f32[8,128], index: 8, kind: output, shape index: {}]  }
   0x1   :  { %v2055_v0 = vld [vmem:[%s2703_s1 + $0x78] sm:$0xff]   ;;  %v2059_v4 = vld [vmem:[%s2703_s1 + $0x70] sm:$0xff]   ;;  %v2063_v8 = vld [vmem:[%s2703_s1 + $0x68] sm:$0xff]   ;;  %vm1254_vm7 = vcmask 261120   ;;  %vm1328_vm12 = vcmask 25600   ;;  %vm1376_vm13 = vcmask 1043456  }
   0x2   :  { %v2056_v1 = vld [vmem:[%s2703_s1 + $0xf8] sm:$0xff]   ;;  %1780 = vmatprep.subr.bf16.mxu0 %v2055_v0  ;;  %v2060_v5 = vld [vmem:[%s2703_s1 + $0xf0] sm:$0xff]   ;;  %v2064_v9 = vld [vmem:[%s2703_s1 + $0xe8] sm:$0xff]  }
   0x3   :  { %v2057_v2 = vld [vmem:[%s2703_s1 + $0x38] sm:$0xff]   ;;  %1808 = vmatprep.subr.bf16.mxu1 %v2056_v1  ;;  %v2061_v6 = vld [vmem:[%s2703_s1 + $0x30] sm:$0xff]   ;;  %v2065_v10 = vld [vmem:[%s2703_s1 + $0x28] sm:$0xff]  }
   0x4   :  { %v2058_v3 = vld [vmem:[%s2703_s1 + $0xb8] sm:$0xff]   ;;  %1781 = vmatpush3.bf16.msra.mxu0 %v2057_v2  ;;  %v2062_v7 = vld [vmem:[%s2703_s1 + $0xb0] sm:$0xff]   ;;  %v2066_v11 = vld [vmem:[%s2703_s1 + $0xa8] sm:$0xff]  }
   0x5   :  { %1809 = vmatpush3.bf16.msra.mxu1 %v2058_v3  ;;  %1782 = vmatprep.subr.bf16.mxu0 %v2059_v4  ;;  %v2067_v12 = vld [vmem:[%s2703_s1 + $0x60] sm:$0xff]   ;;  %v2071_v16 = vld [vmem:[%s2703_s1 + $0x58] sm:$0xff]   ;;  %v2075_v20 = vld [vmem:[%s2703_s1 + $0x50] sm:$0xff]  }
   0x6   :  { %1810 = vmatprep.subr.bf16.mxu1 %v2060_v5  ;;  %v2068_v13 = vld [vmem:[%s2703_s1 + $0xe0] sm:$0xff]   ;;  %v2072_v17 = vld [vmem:[%s2703_s1 + $0xd8] sm:$0xff]   ;;  %v2076_v21 = vld [vmem:[%s2703_s1 + $0xd0] sm:$0xff]  }
   0x7   :  { %v2069_v14 = vld [vmem:[%s2703_s1 + $0x20] sm:$0xff]   ;;  %v2073_v18 = vld [vmem:[%s2703_s1 + $0x18] sm:$0xff]   ;;  %v2077_v22 = vld [vmem:[%s2703_s1 + $0x10] sm:$0xff]  }
   0x8   :  { %1783 = vmatpush3.bf16.msra.mxu0 %v2061_v6  ;;  %v2070_v15 = vld [vmem:[%s2703_s1 + $0xa0] sm:$0xff]   ;;  %v2074_v19 = vld [vmem:[%s2703_s1 + $0x98] sm:$0xff]   ;;  %v2078_v23 = vld [vmem:[%s2703_s1 + $0x90] sm:$0xff]  }
   0x9   :  { %1811 = vmatpush3.bf16.msra.mxu1 %v2062_v7  ;;  %1784 = vmatprep.subr.bf16.mxu0 %v2063_v8  ;;  %v2079_v24 = vld [vmem:[%s2703_s1 + $0x48] sm:$0xff]   ;;  %v2083_v28 = vld [vmem:[%s2703_s1 + $0x40] sm:$0xff]   ;;  %v2087_v40 = vld [vmem:[%s2703_s1 + $0x178] sm:$0xff]  }
   0xa   :  { %1812 = vmatprep.subr.bf16.mxu1 %v2064_v9  ;;  %v2080_v25 = vld [vmem:[%s2703_s1 + $0xc8] sm:$0xff]   ;;  %v2084_v29 = vld [vmem:[%s2703_s1 + $0xc0] sm:$0xff]   ;;  %v2088_v41 = vld [vmem:[%s2703_s1 + $0x1f8] sm:$0xff]  }
   0xb   :  { %v2081_v26 = vld [vmem:[%s2703_s1 + $0x8] sm:$0xff]   ;;  %v2085_v30 = vld [vmem:[%s2703_s1] sm:$0xff]   ;;  %v2089_v42 = vld [vmem:[%s2703_s1 + $0x138] sm:$0xff]  }
   0xc   :  { %1785 = vmatpush3.bf16.msra.mxu0 %v2065_v10  ;;  %v2082_v27 = vld [vmem:[%s2703_s1 + $0x88] sm:$0xff]   ;;  %v2086_v31 = vld [vmem:[%s2703_s1 + $0x80] sm:$0xff]   ;;  %v2090_v43 = vld [vmem:[%s2703_s1 + $0x1b8] sm:$0xff]  }
   0xd   :  { %1813 = vmatpush3.bf16.msra.mxu1 %v2066_v11  ;;  %1786 = vmatprep.subr.bf16.mxu0 %v2067_v12  ;;  %v30_v32 = vld [vmem:[%s2704_s0] sm:$0xff]  ;;  %v31_v34 = vld [vmem:[%s2704_s0 + $0x8] sm:$0xff]  ;;  %v2091_v44 = vld [vmem:[%s2703_s1 + $0x170] sm:$0xff]  }
   0xe   :  { %1814 = vmatprep.subr.bf16.mxu1 %v2068_v13  ;;  %v34_v33 = vld [vmem:[%s2704_s0 + $0x20] sm:$0xff]  ;;  %v35_v37 = vld [vmem:[%s2704_s0 + $0x28] sm:$0xff]  ;;  %v2092_v45 = vld [vmem:[%s2703_s1 + $0x1f0] sm:$0xff]  }
   0xf   :  { %v1686_v35 = vcombine.low %v30_v32, %v34_v33  ;;  %v1687_v36 = vcombine.high %v30_v32, %v34_v33  ;;  %v1688_v38 = vcombine.low %v31_v34, %v35_v37  ;;  %v1689_v39 = vcombine.high %v31_v34, %v35_v37  ;;  %v2093_v46 = vld [vmem:[%s2703_s1 + $0x130] sm:$0xff]   ;;  %v2095_v48 = vld [vmem:[%s2703_s1 + $0x168] sm:$0xff]   ;;  %v2099_v52 = vld [vmem:[%s2703_s1 + $0x160] sm:$0xff]  }
  0x10   :  { %1787 = vmatpush3.bf16.msra.mxu0 %v2069_v14  ;;  %v2094_v47 = vld [vmem:[%s2703_s1 + $0x1b0] sm:$0xff]   ;;  %v2096_v49 = vld [vmem:[%s2703_s1 + $0x1e8] sm:$0xff]   ;;  %v2100_v53 = vld [vmem:[%s2703_s1 + $0x1e0] sm:$0xff]  }
  0x11   :  { %1815 = vmatpush3.bf16.msra.mxu1 %v2070_v15  ;;  %1788 = vmatprep.subr.bf16.mxu0 %v2071_v16  ;;  %v2097_v50 = vld [vmem:[%s2703_s1 + $0x128] sm:$0xff]   ;;  %v2101_v54 = vld [vmem:[%s2703_s1 + $0x120] sm:$0xff]   ;;  %v2103_v56 = vld [vmem:[%s2703_s1 + $0x158] sm:$0xff]  }
  0x12   :  { %1816 = vmatprep.subr.bf16.mxu1 %v2072_v17  ;;  %661 = vmatprep.mubr.bf16.mxu0 %v1687_v36  ;;  %v2098_v51 = vld [vmem:[%s2703_s1 + $0x1a8] sm:$0xff]   ;;  %v2102_v55 = vld [vmem:[%s2703_s1 + $0x1a0] sm:$0xff]   ;;  %v2104_v57 = vld [vmem:[%s2703_s1 + $0x1d8] sm:$0xff]  }
  0x13   :  { %709 = vmatprep.mubr.bf16.mxu1 %v1689_v39  ;;  %v38_v58 = vld [vmem:[%s2704_s0 + $0x40] sm:$0xff]  ;;  %v2106_v60 = vld [vmem:[%s2703_s1 + $0x118] sm:$0xff]   ;;  %v39_v63 = vld [vmem:[%s2704_s0 + $0x48] sm:$0xff] }
  0x14   :  { %1789 = vmatpush3.bf16.msra.mxu0 %v2073_v18  ;;  %v1695_v59 = vcombine.high %v38_v58, %v38_v58  ;;  %v1694_v61 = vcombine.low %v38_v58, %v38_v58  ;;  %v2107_v62 = vld [vmem:[%s2703_s1 + $0x198] sm:$0xff]   ;;  %v1697_v0 = vcombine.high %v39_v63, %v39_v63  ;;  %v1696_v1 = vcombine.low %v39_v63, %v39_v63  ;;  %v2111_v2 = vld [vmem:[%s2703_s1 + $0x150] sm:$0xff]   ;;  %v2115_v6 = vld [vmem:[%s2703_s1 + $0x148] sm:$0xff]  }
  0x15   :  { %1817 = vmatpush3.bf16.msra.mxu1 %v2074_v19  ;;  %1790 = vmatprep.subr.bf16.mxu0 %v2075_v20  ;;  %v2112_v3 = vld [vmem:[%s2703_s1 + $0x1d0] sm:$0xff]   ;;  %v2116_v7 = vld [vmem:[%s2703_s1 + $0x1c8] sm:$0xff]   ;;  %v2119_v10 = vld [vmem:[%s2703_s1 + $0x140] sm:$0xff]  }
  0x16   :  { %1818 = vmatprep.subr.bf16.mxu1 %v2076_v21  ;;  %v2113_v4 = vld [vmem:[%s2703_s1 + $0x110] sm:$0xff]   ;;  %v2117_v8 = vld [vmem:[%s2703_s1 + $0x108] sm:$0xff]   ;;  %v2120_v11 = vld [vmem:[%s2703_s1 + $0x1c0] sm:$0xff]  }
  0x17   :  { %v2114_v5 = vld [vmem:[%s2703_s1 + $0x190] sm:$0xff]   ;;  %v2118_v9 = vld [vmem:[%s2703_s1 + $0x188] sm:$0xff]   ;;  %v2121_v12 = vld [vmem:[%s2703_s1 + $0x100] sm:$0xff]  }
  0x18   :  { %1791 = vmatpush3.bf16.msra.mxu0 %v2077_v22  ;;  %v2122_v13 = vld [vmem:[%s2703_s1 + $0x180] sm:$0xff]   ;;  %v32_v14 = vld [vmem:[%s2704_s0 + $0x10] sm:$0xff]  ;;  %v33_v16 = vld [vmem:[%s2704_s0 + $0x18] sm:$0xff] }
  0x19   :  { %1819 = vmatpush3.bf16.msra.mxu1 %v2078_v23  ;;  %1792 = vmatprep.subr.bf16.mxu0 %v2079_v24  ;;  %v36_v15 = vld [vmem:[%s2704_s0 + $0x30] sm:$0xff]  ;;  %v37_v19 = vld [vmem:[%s2704_s0 + $0x38] sm:$0xff] }
  0x1a   :  { %1820 = vmatprep.subr.bf16.mxu1 %v2080_v25  ;;  %v1690_v17 = vcombine.low %v32_v14, %v36_v15  ;;  %v1691_v18 = vcombine.high %v32_v14, %v36_v15  ;;  %v40_v20 = vld [vmem:[%s2704_s0 + $0x50] sm:$0xff]  ;;  %v41_v21 = vld [vmem:[%s2704_s0 + $0x58] sm:$0xff]  ;;  %v1692_v22 = vcombine.low %v33_v16, %v37_v19  ;;  %v1693_v23 = vcombine.high %v33_v16, %v37_v19 }
  0x1b   :  { %v1699_v24 = vcombine.high %v40_v20, %v40_v20  ;;  %v1701_v25 = vcombine.high %v41_v21, %v41_v21 }
  0x1c   :  { %1793 = vmatpush3.bf16.msra.mxu0 %v2081_v26  ;;  %v1698_v26 = vcombine.low %v40_v20, %v40_v20 }
  0x1d   :  { %1821 = vmatpush3.bf16.msra.mxu1 %v2082_v27  ;;  %1794 = vmatprep.subr.bf16.mxu0 %v2083_v28  ;;  %v1700_v27 = vcombine.low %v41_v21, %v41_v21  ;;  %v2153_v28 = vmov 0.0  }
  0x1e   :  { %1822 = vmatprep.subr.bf16.mxu1 %v2084_v29  ;;  %v867_v29 = vld [vmem:[%s2705_s7] sm:$0x1f] }
  0x20   :  { %1795 = vmatpush3.bf16.msra.mxu0 %v2085_v30  ;;  %v2436_v30 = vmax.f32 %v867_v29, 0.0 }
  0x21   :  { %1823 = vmatpush3.bf16.msra.mxu1 %v2086_v31  ;;  %1836 = vmatprep.subr.bf16.mxu0 %v2087_v40 }
  0x22   :  { %1864 = vmatprep.subr.bf16.mxu1 %v2088_v41  ;;  %v869_v31 = vmul.f32 %v2436_v30, %v2436_v30 }
  0x23   :  { %662 = vmatmul.mubr.bf16.vlgmr.msra.gmra.mxu0 %v1686_v35 }
  0x24   :  { %710 = vmatmul.mubr.bf16.vlgmr.msra.gmra.mxu1 %v1688_v38  ;;  %1837 = vmatpush3.bf16.msra.mxu0 %v2089_v42 }
  0x25   :  { %1865 = vmatpush3.bf16.msra.mxu1 %v2090_v43  ;;  %1838 = vmatprep.subr.bf16.mxu0 %v2091_v44 }
  0x26   :  { %1866 = vmatprep.subr.bf16.mxu1 %v2092_v45  ;;  %669 = vmatprep.mubr.bf16.mxu0 %v1695_v59 }
  0x27   :  { %717 = vmatprep.mubr.bf16.mxu1 %v1697_v0 }
  0x28   :  { %1839 = vmatpush3.bf16.msra.mxu0 %v2093_v46 }
  0x29   :  { %1867 = vmatpush3.bf16.msra.mxu1 %v2094_v47  ;;  %1840 = vmatprep.subr.bf16.mxu0 %v2095_v48  ;;  %v821_v48 = vlaneseq }
  0x2a   :  { %1868 = vmatprep.subr.bf16.mxu1 %v2096_v49 }
  0x2b   :  { %670 = vmatmul.mubr.bf16.gmra.mxu0 %v1694_v61 }
  0x2c   :  { %1841 = vmatpush3.bf16.msra.mxu0 %v2097_v50  ;;  %718 = vmatmul.mubr.bf16.gmra.mxu1 %v1696_v1  ;;  %v1685_v50 = vld [vmem:[%s2706_s2] ss:$0 sm:$0xff] }
  0x2d   :  { %1869 = vmatpush3.bf16.msra.mxu1 %v2098_v51  ;;  %1842 = vmatprep.subr.bf16.mxu0 %v2099_v52  ;;  %v2450_v52 = vshrl.u32 %v821_v48, 7 }
  0x2e   :  { %1870 = vmatprep.subr.bf16.mxu1 %v2100_v53  ;;  %757 = vmatprep.mubr.bf16.mxu0 %v1691_v18 }
  0x2f   :  { %805 = vmatprep.mubr.bf16.mxu1 %v1693_v23  ;;  %v2453_v59 = vand.u32 7, %v2450_v52 }
  0x30   :  { %1843 = vmatpush3.bf16.msra.mxu0 %v2101_v54 }
  0x31   :  { %1871 = vmatpush3.bf16.msra.mxu1 %v2102_v55  ;;  %1844 = vmatprep.subr.bf16.mxu0 %v2103_v56  ;;  %vm861_vm2 = vcmp.lt.s32.totalorder %v2453_v59, 2  ;;  %vm1340_vm14 = vcmp.eq.s32.totalorder %v2453_v59, 0  ;;  %vm1350_vm15 = vcmp.eq.s32.totalorder %v2453_v59, 1 }
  0x32   :  { %1872 = vmatprep.subr.bf16.mxu1 %v2104_v57 }
  0x34   :  { %1845 = vmatpush3.bf16.msra.mxu0 %v2106_v60  ;;  %v823_v60 = vadd.s32 8, %v2450_v52 }
  0x35   :  { %1873 = vmatpush3.bf16.msra.mxu1 %v2107_v62  ;;  %1846 = vmatprep.subr.bf16.mxu0 %v2111_v2 }
  0x36   :  { %1874 = vmatprep.subr.bf16.mxu1 %v2112_v3 }
  0x38   :  { %1847 = vmatpush3.bf16.msra.mxu0 %v2113_v4 }
  0x39   :  { %1875 = vmatpush3.bf16.msra.mxu1 %v2114_v5  ;;  %1848 = vmatprep.subr.bf16.mxu0 %v2115_v6 }
  0x3a   :  { %1876 = vmatprep.subr.bf16.mxu1 %v2116_v7 }
  0x3c   :  { %1849 = vmatpush3.bf16.msra.mxu0 %v2117_v8  ;;  %v2457_v8 = vand.u32 7, %v823_v60 }
  0x3d   :  { %1877 = vmatpush3.bf16.msra.mxu1 %v2118_v9  ;;  %1850 = vmatprep.subr.bf16.mxu0 %v2119_v10  ;;  %v824_v9 = vadd.s32 16, %v2450_v52 }
  0x3e   :  { %1878 = vmatprep.subr.bf16.mxu1 %v2120_v11  ;;  %vm862_vm3 = vcmp.lt.s32.totalorder %v2457_v8, 2 }
  0x40   :  { %1851 = vmatpush3.bf16.msra.mxu0 %v2121_v12 }
  0x41   :  { %1879 = vmatpush3.bf16.msra.mxu1 %v2122_v13  ;;  %1932 = vmatprep.subr.mxu0 %v2153_v28 }
  0x42   :  { %1943 = vmatprep.subr.mxu1 %v2153_v28 }
  0x43   :  { %758 = vmatmul.mubr.bf16.vlgmr.msra.gmra.mxu0 %v1690_v17 }
  0x44   :  { %806 = vmatmul.mubr.bf16.vlgmr.msra.gmra.mxu1 %v1692_v22  ;;  %765 = vmatprep.mubr.bf16.mxu0 %v1699_v24  ;;  %v2465_v22 = vand.u32 7, %v824_v9  ;;  %v1464_v9 = vsel %vm1463_vm5, %v2436_v30, 0.0 }
  0x45   :  { %813 = vmatprep.mubr.bf16.mxu1 %v1701_v25  ;;  %1933 = vmatpush3.xpose.msk.msra.mxu0 %vm873_vm0, %v869_v31 }
  0x46   :  { %1962 = vmatprep.subr.mxu0 %v2153_v28  ;;  %vm863_vm4 = vcmp.lt.s32.totalorder %v2465_v22, 2  ;;  %vm1352_vm5 = vcmp.eq.s32.totalorder %v2465_v22, 1 }
  0x4b   :  { %766 = vmatmul.mubr.bf16.gmra.mxu0 %v1698_v26 }
  0x4c   :  { %814 = vmatmul.mubr.bf16.gmra.mxu1 %v1700_v27  ;;  %1934 = vmatprep.mubr.msk.f32.mxu0 %vm2154_vm1, %v2153_v28 }
  0x4d   :  { %1959 = vmatprep.mubr.msk.f32.mxu1 %vm2154_vm1, %v2153_v28 }
  0xe3   :  { %v1796_v32 = vpop.f32.mrf.mxu0 }
  0xe4   :  { %v1824_v33 = vpop.f32.mrf.mxu1 }
  0xe5   :  { %v1797_v34 = vpop.f32.mrf.mxu0 }
  0xe6   :  { %v1825_v35 = vpop.f32.mrf.mxu1  ;;  %v1798_v49 = vadd.f32 %v1797_v34, %v1796_v32 }
  0xe7   :  { %v1799_v36 = vpop.f32.mrf.mxu0  ;;  %v1826_v54 = vadd.f32 %v1825_v35, %v1824_v33 }
  0xe8   :  { %v1827_v37 = vpop.f32.mrf.mxu1  ;;  %v664_v53 = vadd.f32 %v1798_v49, %v1685_v50  ;;  %v994_v49 = vld [vmem:[%s2707_s3 + $0x20] sm:$0xff] }
  0xe9   :  { %v1800_v38 = vpop.f32.mrf.mxu0 }
  0xea   :  { %v1828_v39 = vpop.f32.mrf.mxu1  ;;  %v1801_v51 = vadd.f32 %v1800_v38, %v1799_v36  ;;  %v712_v61 = vadd.f32 %v1826_v54, %v664_v53  ;;  %v1000_v53 = vld [vmem:[%s2707_s3 + $0x50] sm:$0xff]  ;;  %v999_v54 = vld [vmem:[%s2707_s3 + $0x48] sm:$0xff] }
  0xeb   :  { %v1802_v40 = vpop.f32.mrf.mxu0  ;;  %v1829_v1 = vadd.f32 %v1828_v39, %v1827_v37 }
  0xec   :  { %v1830_v42 = vpop.f32.mrf.mxu1  ;;  %v667_v57 = vadd.f32 %v1801_v51, %v1685_v50  ;;  %v993_v51 = vld [vmem:[%s2707_s3 + $0x18] sm:$0xff] }
  0xed   :  { %v1803_v41 = vpop.f32.mrf.mxu0 }
  0xee   :  { %v1831_v44 = vpop.f32.mrf.mxu1  ;;  %v1804_v62 = vadd.f32 %v1803_v41, %v1802_v40  ;;  %v715_v6 = vadd.f32 %v1829_v1, %v667_v57  ;;  %v2155_v40 = vmov 4   ;;  %v1005_v41 = vld [vmem:[%s2707_s3 + $0x78] sm:$0xff]  ;;  %v998_v1 = vld [vmem:[%s2707_s3 + $0x40] sm:$0xff] }
  0xef   :  { %v1805_v43 = vpop.f32.mrf.mxu0  ;;  %v1832_v11 = vadd.f32 %v1831_v44, %v1830_v42  ;;  %2053 = vset.pattern.permute.xlu0 %v2155_v40  ;;  %2054 = vset.pattern.permute.xlu1 %v2155_v40  ;;  %v1004_v42 = vld [vmem:[%s2707_s3 + $0x70] sm:$0xff] }
  0xf0   :  { %v1833_v46 = vpop.f32.mrf.mxu1  ;;  %v672_v10 = vadd.f32 %v1804_v62, %v1685_v50  ;;  %1944 = vmatpush3.msra.mxu1 %v1005_v41  ;;  %v997_v43 = vld [vmem:[%s2707_s3 + $0x38] sm:$0xff]  ;;  %v996_v44 = vld [vmem:[%s2707_s3 + $0x30] sm:$0xff] }
  0xf1   :  { %v1806_v45 = vpop.f32.mrf.mxu0  ;;  %1945 = vmatprep.subr.mxu1 %v2153_v28  ;;  %v995_v46 = vld [vmem:[%s2707_s3 + $0x28] sm:$0xff]  ;;  %v1001_v50 = vld [vmem:[%s2707_s3 + $0x58] sm:$0xff] }
  0xf2   :  { %v1834_v47 = vpop.f32.mrf.mxu1  ;;  %v720_v23 = vadd.f32 %v1832_v11, %v672_v10  ;;  %v1003_v45 = vld [vmem:[%s2707_s3 + $0x68] sm:$0xff]  ;;  %1946 = vmatpush3.msra.mxu1 %v1004_v42  ;;  %v1246_v41 = vld [vmem:[%s2708_s5 + $0x18] sm:$0xff]  ;;  %v1245_v42 = vld [vmem:[%s2708_s5 + $0x10] sm:$0xff] }
  0xf3   :  { %1947 = vmatprep.subr.mxu1 %v2153_v28  ;;  %v1002_v47 = vld [vmem:[%s2707_s3 + $0x60] sm:$0xff] }
  0xf4   :  { %1948 = vmatpush3.msra.mxu1 %v1003_v45 }
  0xf5   :  { %1949 = vmatprep.subr.mxu1 %v2153_v28 }
  0xf6   :  { %1950 = vmatpush3.msra.mxu1 %v1002_v47 }
  0xf7   :  { %1951 = vmatprep.subr.mxu1 %v2153_v28 }
  0xf8   :  { %1952 = vmatpush3.msra.mxu1 %v1001_v50 }
  0xf9   :  { %1953 = vmatprep.subr.mxu1 %v2153_v28 }
  0xfa   :  { %1954 = vmatpush3.msra.mxu1 %v1000_v53 }
  0xfb   :  { %1955 = vmatprep.subr.mxu1 %v2153_v28 }
  0xfc   :  { %1956 = vmatpush3.msra.mxu1 %v999_v54 }
  0xfd   :  { %1957 = vmatprep.subr.mxu1 %v2153_v28 }
  0xfe   :  { %1958 = vmatpush3.msra.mxu1 %v998_v1 }
  0xff   :  { %1981 = vmatprep.subr.mxu1 %v2153_v28 }
 0x103   :  { %v1852_v55 = vpop.f32.mrf.mxu0 }
 0x104   :  { %v1880_v56 = vpop.f32.mrf.mxu1 }
 0x105   :  { %v1853_v58 = vpop.f32.mrf.mxu0 }
 0x106   :  { %v1854_v63 = vadd.f32 %v1853_v58, %v1852_v55  ;;  %v1881_v0 = vpop.f32.mrf.mxu1 }
 0x107   :  { %v1855_v2 = vpop.f32.mrf.mxu0  ;;  %v1882_v4 = vadd.f32 %v1881_v0, %v1880_v56 }
 0x108   :  { %v760_v3 = vadd.f32 %v1854_v63, %v712_v61  ;;  %v1883_v5 = vpop.f32.mrf.mxu1 }
 0x109   :  { %v1856_v7 = vpop.f32.mrf.mxu0 }
 0x10a   :  { %v808_v12 = vadd.f32 %v1882_v4, %v760_v3  ;;  %v1857_v13 = vadd.f32 %v1856_v7, %v1855_v2  ;;  %v1884_v14 = vpop.f32.mrf.mxu1  ;;  %v992_v2 = vld [vmem:[%s2707_s3 + $0x10] sm:$0xff]  ;;  %v991_v4 = vld [vmem:[%s2707_s3 + $0x8] sm:$0xff] }
 0x10b   :  { %v1858_v15 = vpop.f32.mrf.mxu0  ;;  %v1885_v18 = vadd.f32 %v1884_v14, %v1883_v5  ;;  %v990_v5 = vld [vmem:[%s2707_s3] sm:$0xff] }
 0x10c   :  { %v2460_v16 = vsel %vm861_vm2, %v808_v12, 0.0  ;;  %v763_v17 = vadd.f32 %v1857_v13, %v715_v6  ;;  %v1886_v19 = vpop.f32.mrf.mxu1  ;;  %v1159_v12 = vld [vmem:[%s2707_s3 + $0xb8] sm:$0xff]  ;;  %v1158_v13 = vld [vmem:[%s2707_s3 + $0xb0] sm:$0xff]  ;;  %vm1341_vm2 = vcmp.eq.s32.totalorder %v2457_v8, 0 }
 0x10d   :  { %v870_v20 = vmul.f32 %v2460_v16, %v2460_v16  ;;  %v1859_v21 = vpop.f32.mrf.mxu0 }
 0x10e   :  { %v811_v24 = vadd.f32 %v1885_v18, %v763_v17  ;;  %v1860_v25 = vadd.f32 %v1859_v21, %v1858_v15  ;;  %v1887_v26 = vpop.f32.mrf.mxu1  ;;  %v1157_v18 = vld [vmem:[%s2707_s3 + $0xa8] sm:$0xff] }
 0x10f   :  { %v1888_v27 = vadd.f32 %v1887_v26, %v1886_v19  ;;  %1935 = vmatmul.mubr.msk.f32.vlgmr.msra.gmra.mxu0 %vm873_vm0, %v870_v20  ;;  %v1861_v29 = vpop.f32.mrf.mxu0  ;;  %v1156_v19 = vld [vmem:[%s2707_s3 + $0xa0] sm:$0xff] }
 0x110   :  { %v2468_v31 = vsel %vm862_vm3, %v811_v24, 0.0  ;;  %v768_v32 = vadd.f32 %v1860_v25, %v720_v23  ;;  %1937 = vmatprep.mubr.msk.f32.mxu0 %vm2154_vm1, %v2153_v28  ;;  %v1889_v33 = vpop.f32.mrf.mxu1  ;;  %1963 = vmatpush3.msra.mxu0 %v997_v43  ;;  %v1155_v23 = vld [vmem:[%s2707_s3 + $0x98] sm:$0xff]  ;;  %v1154_v24 = vld [vmem:[%s2707_s3 + $0x90] sm:$0xff]  ;;  %v1153_v25 = vld [vmem:[%s2707_s3 + $0x88] sm:$0xff]  ;;  %vm1351_vm3 = vcmp.eq.s32.totalorder %v2457_v8, 1 }
 0x111   :  { %v871_v34 = vmul.f32 %v2468_v31, %v2468_v31  ;;  %v1862_v35 = vpop.f32.mrf.mxu0  ;;  %1964 = vmatprep.subr.mxu0 %v2153_v28  ;;  %v1152_v26 = vld [vmem:[%s2707_s3 + $0x80] sm:$0xff]  ;;  %v1244_v43 = vld [vmem:[%s2708_s5 + $0x8] sm:$0xff] }
 0x112   :  { %v816_v36 = vadd.f32 %v1888_v27, %v768_v32  ;;  %v1890_v37 = vpop.f32.mrf.mxu1  ;;  %1965 = vmatpush3.msra.mxu0 %v996_v44  ;;  %v1243_v44 = vld [vmem:[%s2708_s5] sm:$0xff] }
 0x113   :  { %1938 = vmatmul.mubr.msk.f32.gmra.mxu0 %vm873_vm0, %v871_v34  ;;  %1966 = vmatprep.subr.mxu0 %v2153_v28 }
 0x114   :  { %v2476_v38 = vsel %vm863_vm4, %v816_v36, 0.0  ;;  %1940 = vmatprep.mubr.msk.f32.mxu0 %vm2154_vm1, %v2153_v28  ;;  %1967 = vmatpush3.msra.mxu0 %v995_v46  ;;  %vm1342_vm4 = vcmp.eq.s32.totalorder %v2465_v22, 0 }
 0x115   :  { %v872_v39 = vmul.f32 %v2476_v38, %v2476_v38  ;;  %1968 = vmatprep.subr.mxu0 %v2153_v28 }
 0x116   :  { %1969 = vmatpush3.msra.mxu0 %v994_v49 }
 0x117   :  { %1941 = vmatmul.mubr.msk.f32.gmra.mxu0 %vm873_vm0, %v872_v39  ;;  %1970 = vmatprep.subr.mxu0 %v2153_v28 }
 0x118   :  { %1978 = vmatprep.mubr.msk.f32.mxu0 %vm2154_vm1, %v2153_v28  ;;  %1971 = vmatpush3.msra.mxu0 %v993_v51 }
 0x119   :  { %1972 = vmatprep.subr.mxu0 %v2153_v28 }
 0x11a   :  { %1973 = vmatpush3.msra.mxu0 %v992_v2 }
 0x11b   :  { %1974 = vmatprep.subr.mxu0 %v2153_v28 }
 0x11c   :  { %1975 = vmatpush3.msra.mxu0 %v991_v4  ;;  %v1773_v4 = vld [vmem:[%s2709_s4] ss:$0 sm:$0xff] }
 0x11d   :  { %1976 = vmatprep.subr.mxu0 %v2153_v28 }
 0x11e   :  { %1977 = vmatpush3.msra.mxu0 %v990_v5 }
 0x11f   :  { %2000 = vmatprep.subr.mxu0 %v2153_v28 }
 0x1cf   :  { %v2533_v55 = vpop.f32.mrf.mxu0 }
 0x1d0   :  { %v966_v60 = vmax.f32 %v2533_v55, 1e-24 }
 0x1d1   :  { %v1936_v56 = vpop.f32.mrf.mxu0 }
 0x1d3   :  { %v2535_v57 = vpop.f32.mrf.mxu0 }
 0x1d4   :  { %v967_v58 = vmax.f32 %v2535_v57, 1e-24 }
 0x1d5   :  { %v1939_v61 = vpop.f32.mrf.mxu0 }
 0x1d6   :  { %2127 = vrsqrt.f32 %v967_v58 }
 0x1d7   :  { %v2539_v62 = vpop.f32.mrf.mxu0  ;;  %2129 = vrsqrt.f32 %v966_v60 }
 0x1d8   :  { %v968_v63 = vmax.f32 %v2539_v62, 1e-24 }
 0x1d9   :  { %v1942_v0 = vpop.f32.mrf.mxu0 }
 0x1da   :  { %2131 = vrsqrt.f32 %v968_v63 }
 0x1e3   :  { %v2550_v3 = vpop.eup %2127 }
 0x1e4   :  { %979 = vperm.xlu0 %2053, %v2550_v3   ;;  %v2560_v6 = vpop.eup %2129 }
 0x1e7   :  { %v2562_v7 = vpop.eup %2131 }
 0x1e8   :  { %974 = vperm.xlu0 %2053, %v2560_v6   ;;  %984 = vperm.xlu1 %2054, %v2562_v7  }
 0x1ec   :  { %1479 = vrot.lane.b32.xlu1 %v2533_v55, %s2156_s9 }
 0x207   :  { %1465 = vadd.xlane.f32.xlu0 %v1464_v9 }
 0x21d   :  { %1503 = vrot.lane.b32.xlu0 %v2535_v57, %s2156_s9 }
 0x25f   :  { %v980_v10 = vpop.permute.xlu0 %979 }
 0x260   :  { %v988_v11 = vmul.f32 %v980_v10, %v2468_v31 }
 0x262   :  { %1960 = vmatmul.mubr.msk.f32.vlgmr.msra.gmra.mxu1 %vm873_vm0, %v988_v11 }
 0x263   :  { %1982 = vmatpush3.msra.mxu1 %v1159_v12  ;;  %v975_v14 = vpop.permute.xlu0 %974  ;;  %v985_v15 = vpop.permute.xlu1 %984  ;;  %1997 = vmatprep.mubr.msk.f32.mxu1 %vm2154_vm1, %v2153_v28 }
 0x264   :  { %1983 = vmatprep.subr.mxu1 %v2153_v28  ;;  %v987_v17 = vmul.f32 %v975_v14, %v2460_v16  ;;  %v989_v27 = vmul.f32 %v985_v15, %v2476_v38 }
 0x265   :  { %1984 = vmatpush3.msra.mxu1 %v1158_v13 }
 0x266   :  { %1985 = vmatprep.subr.mxu1 %v2153_v28  ;;  %1979 = vmatmul.mubr.msk.f32.vlgmr.msra.gmra.mxu0 %vm873_vm0, %v987_v17 }
 0x267   :  { %1986 = vmatpush3.msra.mxu1 %v1157_v18  ;;  %v1480_v20 = vpop.permute.xlu1 %1479  ;;  %2008 = vmatprep.mubr.msk.f32.mxu0 %vm2154_vm1, %v2153_v28 }
 0x268   :  { %1987 = vmatprep.subr.mxu1 %v2153_v28  ;;  %v1483_v21 = vsel %vm1482_vm6, %v1480_v20, 0.0  ;;  %2001 = vmatpush3.msra.mxu0 %v1246_v41 }
 0x269   :  { %1988 = vmatpush3.msra.mxu1 %v1156_v19  ;;  %1484 = vadd.xlane.f32.xlu1 %v1483_v21 }
 0x26a   :  { %1989 = vmatprep.subr.mxu1 %v2153_v28  ;;  %2002 = vmatprep.subr.mxu0 %v2153_v28 }
 0x26b   :  { %1990 = vmatpush3.msra.mxu1 %v1155_v23  ;;  %2003 = vmatpush3.msra.mxu0 %v1245_v42 }
 0x26c   :  { %1991 = vmatprep.subr.mxu1 %v2153_v28  ;;  %2004 = vmatprep.subr.mxu0 %v2153_v28 }
 0x26d   :  { %1992 = vmatpush3.msra.mxu1 %v1154_v24  ;;  %2005 = vmatpush3.msra.mxu0 %v1244_v43 }
 0x26e   :  { %1993 = vmatprep.subr.mxu1 %v2153_v28  ;;  %2006 = vmatprep.subr.mxu0 %v2153_v28 }
 0x26f   :  { %1994 = vmatpush3.msra.mxu1 %v1153_v25  ;;  %2007 = vmatpush3.msra.mxu0 %v1243_v44 }
 0x270   :  { %1995 = vmatprep.subr.mxu1 %v2153_v28 }
 0x271   :  { %1996 = vmatpush3.msra.mxu1 %v1152_v26 }
 0x272   :  { %1998 = vmatmul.mubr.msk.f32.vlgmr.msra.gmra.mxu1 %vm873_vm0, %v989_v27  ;;  %2011 = vmatprep.subr.mxu1 %v2153_v28 }
 0x273   :  { %2013 = vmatprep.mubr.msk.f32.mxu1 %vm2154_vm1, %v2153_v28  ;;  %2012 = vmatpush3.msk.msra.mxu1 %vm1376_vm13, %v2436_v30 }
 0x290   :  { %v1466_v29 = vpop.xlane.xlu0 %1465 }
 0x291   :  { %v1467_v32 = vrot.slane %v1466_v29, 4 }
 0x293   :  { %v1468_v33 = vadd.f32 %v1467_v32, %v1466_v29 }
 0x294   :  { %v1504_v34 = vpop.permute.xlu0 %1503 }
 0x295   :  { %v1469_v35 = vrot.slane %v1468_v33, 2  ;;  %v1506_v36 = vsel %vm1482_vm6, %v1504_v34, 0.0 }
 0x296   :  { %1507 = vadd.xlane.f32.xlu1 %v1506_v36 }
 0x297   :  { %v1470_v37 = vadd.f32 %v1469_v35, %v1468_v33  ;;  %v1774_v33 = vld [vmem:[%s2710_s6] ss:$0 sm:$0xff] }
 0x299   :  { %v1471_v39 = vrot.slane %v1470_v37, 1 }
 0x29b   :  { %v1472_v40 = vadd.f32 %v1471_v39, %v1470_v37  ;;  %v1553_v39 = vmul.f32 %v2560_v6, %v2560_v6 }
 0x29d   :  { %2022 = vpush %v1472_v40  ;;  %v1556_v40 = vmul.f32 %v1553_v39, %v2533_v55  ;;  %v1554_v55 = vmul.f32 %v2550_v3, %v2550_v3 }
 0x2ce   :  { %s2633_s29 = spop %2022 }
 0x2cf   :  { %s1474_s1 = smul.f32 2.0, %s2633_s29 }
 0x2d1   :  { %s1477_s22 = smul.f32 0.25, %s1474_s1 }
 0x2f2   :  { %v1485_v45 = vpop.xlane.xlu1 %1484 }
 0x2f3   :  { %v1486_v46 = vrot.slane %v1485_v45, 4 }
 0x2f5   :  { %v1487_v47 = vadd.f32 %v1486_v46, %v1485_v45 }
 0x2f7   :  { %v1488_v49 = vrot.slane %v1487_v47, 2 }
 0x2f9   :  { %v1489_v50 = vadd.f32 %v1488_v49, %v1487_v47 }
 0x2fb   :  { %v1490_v51 = vrot.slane %v1489_v50, 1 }
 0x2fd   :  { %v1491_v53 = vadd.f32 %v1490_v51, %v1489_v50  ;;  %v1557_v51 = vmul.f32 %v1554_v55, %v2535_v57  ;;  %v1555_v57 = vmul.f32 %v2562_v7, %v2562_v7 }
 0x2ff   :  { %2024 = vpush %v1491_v53  ;;  %v1558_v30 = vmul.f32 %v1555_v57, %v2539_v62 }
 0x31f   :  { %v1508_v61 = vpop.xlane.xlu1 %1507 }
 0x320   :  { %v1509_v63 = vrot.slane %v1508_v61, 4 }
 0x322   :  { %v1075_v54 = vpop.f32.mrf.mxu1  ;;  %v1510_v5 = vadd.f32 %v1509_v63, %v1508_v61 }
 0x324   :  { %v1961_v56 = vpop.f32.mrf.mxu1  ;;  %v1511_v12 = vrot.slane %v1510_v5, 2 }
 0x326   :  { %v1148_v58 = vpop.f32.mrf.mxu0  ;;  %v1512_v14 = vadd.f32 %v1511_v12, %v1510_v5  ;;  %v1345_v5 = vsub.s32 0, %v2450_v52 }
 0x327   :  { %v1149_v0 = vadd.f32 %v1148_v58, %v1075_v54 }
 0x328   :  { %v1980_v60 = vpop.f32.mrf.mxu0  ;;  %v1513_v17 = vrot.slane %v1512_v14, 1 }
 0x32a   :  { %v1514_v23 = vadd.f32 %v1513_v17, %v1512_v14 }
 0x330   :  { %s2025_s30 = spop %2024 }
 0x331   :  { %v1493_v1 = vstv %s2025_s30 }
 0x332   :  { %2133 = vrsqrt.f32 %v1493_v1  ;;  %v1229_v2 = vpop.f32.mrf.mxu1  ;;  %vm1496_vm8 = vcmp.eq.f32.partialorder %v1493_v1, inf  ;;  %v1499_v19 = vand.u32 2147483648, %v1493_v1  ;;  %vm1498_vm9 = vcmp.eq.f32.partialorder %v1493_v1, 0.0 }
 0x333   :  { %v1233_v9 = vadd.f32 %v1229_v2, %v1149_v0 }
 0x334   :  { %v1999_v10 = vpop.f32.mrf.mxu1 }
 0x335   :  { %v1241_v11 = vadd.f32 %v1773_v4, %v1233_v9  ;;  %v1355_v9 = vsub.s32 1, %v2450_v52 }
 0x337   :  { %v1242_v13 = vmax.f32 %v1241_v11, 0.0 }
 0x339   :  { %2009 = vmatmul.mubr.msk.f32.vlgmr.msra.gmra.mxu0 %vm1254_vm7, %v1242_v13  ;;  %vm1366_vm7 = vcmask 31744  }
 0x33f   :  { %v2134_v15 = vpop.eup %2133 }
 0x340   :  { %v1495_v18 = vmul.f32 %v2134_v15, %v1493_v1 }
 0x342   :  { %v1497_v20 = vsel %vm1496_vm8, %v1493_v1, %v1495_v18 }
 0x343   :  { %v1500_v21 = vsel %vm1498_vm9, %v1499_v19, %v1497_v20 }
 0x344   :  { %2026 = vpush %v1500_v21 }
 0x345   :  { %2028 = vpush %v1514_v23 }
 0x375   :  { %s2638_s4 = spop %2026 }
 0x376   :  { %s2029_s11 = spop %2028 }
 0x377   :  { %v1516_v24 = vstv %s2029_s11 }
 0x378   :  { %2135 = vrsqrt.f32 %v1516_v24  ;;  %vm1519_vm10 = vcmp.eq.f32.partialorder %v1516_v24, inf  ;;  %v1522_v27 = vand.u32 2147483648, %v1516_v24  ;;  %vm1521_vm11 = vcmp.eq.f32.partialorder %v1516_v24, 0.0 }
 0x385   :  { %v2136_v25 = vpop.eup %2135 }
 0x386   :  { %v1518_v26 = vmul.f32 %v2136_v25, %v1516_v24 }
 0x388   :  { %v1520_v29 = vsel %vm1519_vm10, %v1516_v24, %v1518_v26 }
 0x389   :  { %v1523_v32 = vsel %vm1521_vm11, %v1522_v27, %v1520_v29 }
 0x38a   :  { %2030 = vpush %v1523_v32 }
 0x3bb   :  { %s2678_s6 = spop %2030 }
 0x3bc   :  { %s1525_s21 = sadd.f32 %s2678_s6, %s2638_s4 }
 0x3f9   :  { %v1324_v34 = vpop.f32.mrf.mxu0 }
 0x3fa   :  { %v1325_v35 = vadd.f32 %v1774_v33, %v1324_v34 }
 0x3fb   :  { %v2010_v36 = vpop.f32.mrf.mxu0 }
 0x3fc   :  { %v1329_v37 = vsel %vm1328_vm12, %v1325_v35, -inf }
 0x3fd   :  { %1330 = vmax.xlane.f32.xlu1 %v1329_v37 }
 0x40e   :  { %1527 = vrot.lane.b32.xlu1 %v2539_v62, %s2156_s9 }
 0x412   :  { %1560 = vrot.lane.b32.xlu1 %v1556_v40, %s2157_s14 }
 0x486   :  { %v1331_v41 = vpop.xlane.xlu1 %1330 }
 0x487   :  { %v1332_v42 = vsub.f32 %v1325_v35, %v1331_v41 }
 0x489   :  { %v1333_v43 = vmul.f32 1.442695, %v1332_v42 }
 0x48a   :  { %v1528_v44 = vpop.permute.xlu1 %1527 }
 0x48b   :  { %2137 = vpow2.f32 %v1333_v43  ;;  %v1530_v45 = vsel %vm1482_vm6, %v1528_v44, 0.0 }
 0x48c   :  { %1531 = vadd.xlane.f32.xlu0 %v1530_v45 }
 0x48e   :  { %v1561_v46 = vpop.permute.xlu1 %1560 }
 0x48f   :  { %v1563_v47 = vsel %vm1482_vm6, %v1561_v46, 0.0 }
 0x490   :  { %1564 = vadd.xlane.f32.xlu0 %v1563_v47 }
 0x498   :  { %v2138_v49 = vpop.eup %2137 }
 0x499   :  { %v1335_v50 = vsel %vm1328_vm12, %v2138_v49, 0.0 }
 0x49a   :  { %1336 = vadd.xlane.f32.xlu1 %v1335_v50 }
 0x4a6   :  { %1583 = vrot.lane.b32.xlu0 %v1557_v51, %s2157_s14 }
 0x515   :  { %v1532_v53 = vpop.xlane.xlu0 %1531 }
 0x516   :  { %v1533_v54 = vrot.slane %v1532_v53, 4 }
 0x518   :  { %v1534_v56 = vadd.f32 %v1533_v54, %v1532_v53 }
 0x519   :  { %v1565_v58 = vpop.xlane.xlu0 %1564 }
 0x51a   :  { %v1535_v60 = vrot.slane %v1534_v56, 2  ;;  %v1566_v22 = vrot.slane %v1565_v58, 4 }
 0x51c   :  { %v1536_v61 = vadd.f32 %v1535_v60, %v1534_v56  ;;  %v1567_v25 = vadd.f32 %v1566_v22, %v1565_v58 }
 0x51d   :  { %v1584_v63 = vpop.permute.xlu0 %1583 }
 0x51e   :  { %v1586_v0 = vsel %vm1482_vm6, %v1584_v63, 0.0  ;;  %v1537_v1 = vrot.slane %v1536_v61, 1  ;;  %v1568_v26 = vrot.slane %v1567_v25, 2 }
 0x51f   :  { %1587 = vadd.xlane.f32.xlu1 %v1586_v0 }
 0x520   :  { %v1538_v2 = vadd.f32 %v1537_v1, %v1536_v61  ;;  %v1569_v27 = vadd.f32 %v1568_v26, %v1567_v25 }
 0x522   :  { %2032 = vpush %v1538_v2  ;;  %v1570_v32 = vrot.slane %v1569_v27, 1 }
 0x523   :  { %v1337_v4 = vpop.xlane.xlu1 %1336 }
 0x524   :  { %2139 = vrcp.f32 %v1337_v4  ;;  %v1571_v35 = vadd.f32 %v1570_v32, %v1569_v27 }
 0x530   :  { %1607 = vrot.lane.b32.xlu1 %v1558_v30, %s2157_s14 }
 0x531   :  { %v2140_v10 = vpop.eup %2139 }
 0x532   :  { %v1339_v11 = vmul.f32 %v2140_v10, %v2138_v49 }
 0x534   :  { %v1346_v12 = vrot.slane %v1339_v11, %v1345_v5  ;;  %v1356_v13 = vrot.slane %v1339_v11, %v1355_v9 }
 0x536   :  { %v1347_v14 = vsel %vm1340_vm14, %v1346_v12, 0.0  ;;  %v1357_v62 = vsel %vm1350_vm15, %v1356_v13, 0.0  ;;  %v1348_v15 = vsel %vm1341_vm2, %v1346_v12, 0.0  ;;  %v1358_v17 = vsel %vm1351_vm3, %v1356_v13, 0.0 }
 0x537   :  { %v1360_v18 = vadd.f32 %v1357_v62, %v1347_v14  ;;  %v1361_v20 = vadd.f32 %v1358_v17, %v1348_v15  ;;  %v1349_v59 = vsel %vm1342_vm4, %v1346_v12, 0.0  ;;  %v1359_v21 = vsel %vm1352_vm5, %v1356_v13, 0.0 }
 0x538   :  { %v1362_v23 = vadd.f32 %v1359_v21, %v1349_v59 }
 0x539   :  { %v1363_v19 = vmul.f32 %v2560_v6, %v1360_v18  ;;  %v1364_v8 = vmul.f32 %v2550_v3, %v1361_v20 }
 0x53a   :  { %v1365_v24 = vmul.f32 %v2562_v7, %v1362_v23 }
 0x53b   :  { %2014 = vmatmul.mubr.msk.f32.vlgmr.msra.gmra.mxu1 %vm1366_vm7, %v1363_v19 }
 0x53c   :  { %2016 = vmatprep.mubr.msk.f32.mxu1 %vm2154_vm1, %v2153_v28 }
 0x53f   :  { %2017 = vmatmul.mubr.msk.f32.gmra.mxu1 %vm1366_vm7, %v1364_v8 }
 0x540   :  { %2019 = vmatprep.mubr.msk.f32.mxu1 %vm2154_vm1, %v2153_v28 }
 0x543   :  { %2020 = vmatmul.mubr.msk.f32.gmra.mxu1 %vm1366_vm7, %v1365_v24 }
 0x553   :  { %s2033_s9 = spop %2032 }
 0x554   :  { %v1540_v6 = vstv %s2033_s9 }
 0x555   :  { %2141 = vrsqrt.f32 %v1540_v6  ;;  %vm1543_vm8 = vcmp.eq.f32.partialorder %v1540_v6, inf  ;;  %v1546_v33 = vand.u32 2147483648, %v1540_v6  ;;  %vm1545_vm9 = vcmp.eq.f32.partialorder %v1540_v6, 0.0 }
 0x562   :  { %v2142_v29 = vpop.eup %2141 }
 0x563   :  { %v1542_v3 = vmul.f32 %v2142_v29, %v1540_v6 }
 0x565   :  { %v1544_v34 = vsel %vm1543_vm8, %v1540_v6, %v1542_v3 }
 0x566   :  { %v1547_v28 = vsel %vm1545_vm9, %v1546_v33, %v1544_v34  ;;  %v1660_v33 = vand.u32 127, %v821_v48  ;;  %vm1678_vm9 = vcmp.lt.s32.totalorder %v2450_v52, 2 }
 0x567   :  { %2034 = vpush %v1547_v28 }
 0x568   :  { %2036 = vpush %v1571_v35  ;;  %vm1663_vm2 = vcmp.eq.s32.totalorder %v1660_v33, 1  ;;  %vm1661_vm4 = vcmp.eq.s32.totalorder %v1660_v33, 0  ;;  %vm1666_vm5 = vcmp.eq.s32.totalorder %v1660_v33, 2  ;;  %vm1670_vm7 = vcmp.eq.s32.totalorder %v1660_v33, 3 }
 0x569   :  { %vm1674_vm8 = vcmp.eq.s32.totalorder %v1660_v33, 4 }
 0x598   :  { %s2680_s15 = spop %2034 }
 0x599   :  { %s2037_s16 = spop %2036  ;;  %s1549_s23 = sadd.f32 %s2680_s15, %s1525_s21 }
 0x59a   :  { %v1573_v7 = vstv %s2037_s16 }
 0x59b   :  { %2143 = vrsqrt.f32 %v1573_v7  ;;  %vm1576_vm1 = vcmp.eq.f32.partialorder %v1573_v7, inf  ;;  %v1579_v41 = vand.u32 2147483648, %v1573_v7  ;;  %vm1578_vm10 = vcmp.eq.f32.partialorder %v1573_v7, 0.0  ;;  %s1552_s24 = smul.f32 0.33333334, %s1549_s23 }
 0x5a8   :  { %v2144_v36 = vpop.eup %2143  ;;  %v1588_v37 = vpop.xlane.xlu1 %1587 }
 0x5a9   :  { %v1589_v39 = vrot.slane %v1588_v37, 4  ;;  %v1575_v40 = vmul.f32 %v2144_v36, %v1573_v7 }
 0x5ab   :  { %v1590_v42 = vadd.f32 %v1589_v39, %v1588_v37  ;;  %v1577_v43 = vsel %vm1576_vm1, %v1573_v7, %v1575_v40  ;;  %v1667_v40 = vstv %s1477_s22 }
 0x5ac   :  { %v1580_v44 = vsel %vm1578_vm10, %v1579_v41, %v1577_v43  ;;  %v1608_v45 = vpop.permute.xlu1 %1607  ;;  %v1668_v41 = vsel %vm1666_vm5, %v1667_v40, 0.0 }
 0x5ad   :  { %v1591_v46 = vrot.slane %v1590_v42, 2  ;;  %2038 = vpush %v1580_v44  ;;  %v1610_v47 = vsel %vm1482_vm6, %v1608_v45, 0.0 }
 0x5ae   :  { %1611 = vadd.xlane.f32.xlu0 %v1610_v47 }
 0x5af   :  { %v1592_v49 = vadd.f32 %v1591_v46, %v1590_v42  ;;  %v1671_v42 = vstv %s1552_s24 }
 0x5b0   :  { %v1672_v44 = vsel %vm1670_vm7, %v1671_v42, 0.0 }
 0x5b1   :  { %v1593_v50 = vrot.slane %v1592_v49, 1 }
 0x5b3   :  { %v1594_v55 = vadd.f32 %v1593_v50, %v1592_v49 }
 0x5b5   :  { %2040 = vpush %v1594_v55 }
 0x5de   :  { %s2683_s17 = spop %2038 }
 0x5e6   :  { %s2041_s18 = spop %2040 }
 0x5e7   :  { %v1596_v51 = vstv %s2041_s18 }
 0x5e8   :  { %2145 = vrsqrt.f32 %v1596_v51  ;;  %vm1599_vm11 = vcmp.eq.f32.partialorder %v1596_v51, inf  ;;  %v1602_v56 = vand.u32 2147483648, %v1596_v51  ;;  %vm1601_vm12 = vcmp.eq.f32.partialorder %v1596_v51, 0.0 }
 0x5f5   :  { %v2146_v53 = vpop.eup %2145 }
 0x5f6   :  { %v1598_v54 = vmul.f32 %v2146_v53, %v1596_v51 }
 0x5f8   :  { %v1600_v58 = vsel %vm1599_vm11, %v1596_v51, %v1598_v54 }
 0x5f9   :  { %v1603_v60 = vsel %vm1601_vm12, %v1602_v56, %v1600_v58 }
 0x5fa   :  { %2042 = vpush %v1603_v60 }
 0x5fb   :  { %v1446_v61 = vpop.f32.mrf.mxu1 }
 0x5fc   :  { %v1460_v1 = vmul.f32 %v1446_v61, %v2460_v16 }
 0x5fd   :  { %v2015_v63 = vpop.f32.mrf.mxu1 }
 0x5ff   :  { %v1451_v0 = vpop.f32.mrf.mxu1 }
 0x600   :  { %v1461_v2 = vmul.f32 %v1451_v0, %v2468_v31 }
 0x601   :  { %v2018_v4 = vpop.f32.mrf.mxu1 }
 0x602   :  { %v1633_v57 = vsub.f32 %v1460_v1, %v1461_v2 }
 0x603   :  { %v1456_v30 = vpop.f32.mrf.mxu1 }
 0x604   :  { %v1462_v5 = vmul.f32 %v1456_v30, %v2476_v38  ;;  %v1634_v9 = vadd.f32 1e-06, %v1633_v57 }
 0x605   :  { %v2021_v10 = vpop.f32.mrf.mxu1 }
 0x606   :  { %v1635_v11 = vsub.f32 %v1460_v1, %v1462_v5  ;;  %v1637_v12 = vmul.f32 %v1634_v9, %v1634_v9 }
 0x608   :  { %v1638_v13 = vsel %vm873_vm0, %v1637_v12, 0.0  ;;  %v1636_v14 = vadd.f32 1e-06, %v1635_v11 }
 0x609   :  { %1639 = vadd.xlane.f32.xlu1 %v1638_v13 }
 0x60a   :  { %v1648_v62 = vmul.f32 %v1636_v14, %v1636_v14 }
 0x60c   :  { %v1649_v15 = vsel %vm873_vm0, %v1648_v62, 0.0 }
 0x60d   :  { %1650 = vadd.xlane.f32.xlu0 %v1649_v15 }
 0x62b   :  { %s2690_s19 = spop %2042 }
 0x62c   :  { %s1605_s3 = sadd.f32 %s2690_s19, %s2683_s17 }
 0x637   :  { %v1612_v16 = vpop.xlane.xlu0 %1611 }
 0x638   :  { %v1613_v17 = vrot.slane %v1612_v16, 4 }
 0x63a   :  { %v1614_v31 = vadd.f32 %v1613_v17, %v1612_v16 }
 0x63c   :  { %v1615_v18 = vrot.slane %v1614_v31, 2 }
 0x63e   :  { %v1616_v19 = vadd.f32 %v1615_v18, %v1614_v31 }
 0x640   :  { %v1617_v20 = vrot.slane %v1616_v19, 1 }
 0x642   :  { %v1618_v59 = vadd.f32 %v1617_v20, %v1616_v19 }
 0x644   :  { %2044 = vpush %v1618_v59 }
 0x675   :  { %s2045_s20 = spop %2044 }
 0x676   :  { %v1620_v38 = vstv %s2045_s20 }
 0x677   :  { %2147 = vrsqrt.f32 %v1620_v38  ;;  %vm1623_vm6 = vcmp.eq.f32.partialorder %v1620_v38, inf  ;;  %v1626_v23 = vand.u32 2147483648, %v1620_v38  ;;  %vm1625_vm0 = vcmp.eq.f32.partialorder %v1620_v38, 0.0 }
 0x684   :  { %v2148_v21 = vpop.eup %2147 }
 0x685   :  { %v1622_v8 = vmul.f32 %v2148_v21, %v1620_v38 }
 0x687   :  { %v1624_v24 = vsel %vm1623_vm6, %v1620_v38, %v1622_v8 }
 0x688   :  { %v1627_v22 = vsel %vm1625_vm0, %v1626_v23, %v1624_v24 }
 0x689   :  { %2046 = vpush %v1627_v22 }
 0x692   :  { %v1640_v25 = vpop.xlane.xlu1 %1639 }
 0x693   :  { %vm1643_vm14 = vcmp.eq.f32.partialorder %v1640_v25, inf  ;;  %v1646_v35 = vand.u32 2147483648, %v1640_v25  ;;  %vm1645_vm3 = vcmp.eq.f32.partialorder %v1640_v25, 0.0 }
 0x696   :  { %v1651_v6 = vpop.xlane.xlu0 %1650 }
 0x697   :  { %2149 = vrsqrt.f32 %v1651_v6  ;;  %vm1654_vm13 = vcmp.eq.f32.partialorder %v1651_v6, inf  ;;  %v1657_v34 = vand.u32 2147483648, %v1651_v6  ;;  %vm1656_vm15 = vcmp.eq.f32.partialorder %v1651_v6, 0.0 }
 0x698   :  { %2151 = vrsqrt.f32 %v1640_v25 }
 0x6a4   :  { %v2150_v26 = vpop.eup %2149 }
 0x6a5   :  { %v2152_v27 = vpop.eup %2151  ;;  %v1653_v29 = vmul.f32 %v2150_v26, %v1651_v6 }
 0x6a6   :  { %v1642_v32 = vmul.f32 %v2152_v27, %v1640_v25 }
 0x6a7   :  { %v1655_v3 = vsel %vm1654_vm13, %v1651_v6, %v1653_v29 }
 0x6a8   :  { %v1644_v28 = vsel %vm1643_vm14, %v1640_v25, %v1642_v32  ;;  %v1658_v7 = vsel %vm1656_vm15, %v1657_v34, %v1655_v3 }
 0x6a9   :  { %v1647_v36 = vsel %vm1645_vm3, %v1646_v35, %v1644_v28  ;;  %v1664_v37 = vsel %vm1663_vm2, %v1658_v7, 0.0 }
 0x6aa   :  { %v1662_v39 = vsel %vm1661_vm4, %v1647_v36, 0.0 }
 0x6ab   :  { %v1665_v48 = vadd.f32 %v1664_v37, %v1662_v39 }
 0x6ad   :  { %v1669_v43 = vadd.f32 %v1668_v41, %v1665_v48 }
 0x6af   :  { %v1673_v45 = vadd.f32 %v1672_v44, %v1669_v43 }
 0x6ba   :  { %s2047_s25 = spop %2046 }
 0x6bb   :  { %s1629_s0 = sadd.f32 %s2047_s25, %s1605_s3 }
 0x6bd   :  { %s1632_s7 = smul.f32 0.33333334, %s1629_s0 }
 0x6bf   :  { %v1675_v46 = vstv %s1632_s7 }
 0x6c0   :  { %v1676_v47 = vsel %vm1674_vm8, %v1675_v46, 0.0 }
 0x6c1   :  { %v1677_v49 = vadd.f32 %v1676_v47, %v1673_v45 }
 0x6c3   :  { %v1679_v50 = vsel %vm1678_vm9, %v1677_v49, 0.0 }
 0x6c4   :  { %1680 = vst [vmem:[%s2711_s8] sm:$0xff] %v1679_v50 }

</bundles_post_ra>
